<compile_context>
chip_gen: v7x
topology: tpu7x:2x2x1
jax: 0.10.0
libtpu: 0.0.40
codegen_flags: <defaults>
</compile_context>

<pallas_src>
import functools
import math

import jax
import jax.numpy as jnp
from jax import lax
from jax.experimental import pallas as pl
from jax.experimental.pallas import tpu as pltpu


def _attention_kernel(heads, dim_head, bb, N,
                      x_ref, wq_ref, bq_ref, wk_ref, bk_ref, wv_ref, bv_ref,
                      wo_ref, bo_ref, o_ref):
    """One grid step: a block of `bb` batches, rows already folded to (bb*N, dim)."""
    scale = 1.0 / math.sqrt(dim_head)
    out_dim = o_ref.shape[1]

    # --- Fused QKV projections over the whole folded batch block -------------------------
    # One M = bb*N matmul per projection; bf16 MXU inputs, f32 accumulation, f32 bias add.
    xb = x_ref[...].astype(jnp.bfloat16)                                        # (bb*N, dim)
    q = jnp.dot(xb, wq_ref[...], preferred_element_type=jnp.float32) + bq_ref[0]  # (bb*N, inner)
    k = jnp.dot(xb, wk_ref[...], preferred_element_type=jnp.float32) + bk_ref[0]
    v = jnp.dot(xb, wv_ref[...], preferred_element_type=jnp.float32) + bv_ref[0]

    # --- Per-batch, per-head attention (small static loops) ------------------------------
    for b in range(bb):
        r0 = b * N                                   # sublane-aligned row block (N = 8)
        q_b = q[r0:r0 + N, :]
        k_b = k[r0:r0 + N, :]
        v_b = v[r0:r0 + N, :]

        acc = jnp.zeros((N, out_dim), jnp.float32)   # accumulated output projection
        for h in range(heads):
            c0 = h * dim_head
            q_h = q_b[:, c0:c0 + dim_head].astype(jnp.bfloat16)   # (N, dh)
            k_h = k_b[:, c0:c0 + dim_head].astype(jnp.bfloat16)   # (N, dh)
            v_h = v_b[:, c0:c0 + dim_head].astype(jnp.bfloat16)   # (N, dh)

            # scores: contract the last axis of BOTH operands directly on the MXU
            # (no explicit k_h.T -> no XLU transpose / vreg round-trip).
            s = lax.dot_general(
                q_h, k_h,
                dimension_numbers=(((1,), (1,)), ((), ())),
                preferred_element_type=jnp.float32) * scale        # (N, N) f32

            # Numerically-stable softmax, elementwise math kept in f32.
            m = jnp.max(s, axis=-1, keepdims=True)
            e = jnp.exp(s - m)
            p = e * pl.reciprocal(jnp.sum(e, axis=-1, keepdims=True), approx=True)

            o_h = jnp.dot(p.astype(jnp.bfloat16), v_h,
                          preferred_element_type=jnp.float32)      # (N, dh) f32

            # Per-head accumulated output projection. Wo rows [h*dh, (h+1)*dh) form a
            # sublane-aligned 8-row slice — replaces the lane-axis concat of 8-wide pieces.
            acc = acc + jnp.dot(o_h.astype(jnp.bfloat16),
                                wo_ref[c0:c0 + dim_head, :],
                                preferred_element_type=jnp.float32)  # (N, out_dim)

        o_ref[r0:r0 + N, :] = (acc + bo_ref[0]).astype(o_ref.dtype)


def c_attention_forward(x, params, heads, dim_head, *, grid_blocks=None):
    """x: (B, N, dim) f32. params: (wq, bq, wk, bk, wv, bv, wo, bo) with W as (in, out)."""
    B, N, dim = x.shape
    inner = heads * dim_head
    wq, bq, wk, bk, wv, bv, wo, bo = params

    # Grid over batch blocks:
    #   grid_blocks=2 -> both v7x TensorCores busy ("parallel" axis), bb=B/2 batches folded/step.
    #   grid_blocks=1 -> single step, whole batch folded (strictly fewer steps on 1-TC v5e/v6e).
    if grid_blocks is None:
        grid_blocks = 2 if (B % 2 == 0) else 1
    assert B % grid_blocks == 0, "B must be divisible by grid_blocks"
    bb = B // grid_blocks
    M = bb * N                                   # rows per grid step (multiple of 8)

    # bf16 MXU inputs for the weights (halves weight DMA/VMEM); biases stay f32 (added to
    # the f32 accumulators).
    wq_b, wk_b, wv_b, wo_b = (w.astype(jnp.bfloat16) for w in (wq, wk, wv, wo))

    # Fold (B, N) -> (B*N) rows in the wrapper so the kernel sees a lane-dense 2-D slab.
    x2 = x.reshape(B * N, dim)

    kernel = functools.partial(_attention_kernel, heads, dim_head, bb, N)

    # Constant (grid-invariant) operands. NOTE: at production dims, single-buffer these
    # (pipeline_mode=pl.Buffered(1)) since their index_map never changes across the grid.
    const = lambda shape: pl.BlockSpec(shape, lambda g: tuple(0 for _ in shape))

    out = pl.pallas_call(
        kernel,
        out_shape=jax.ShapeDtypeStruct((B * N, dim), x.dtype),
        grid_spec=pltpu.PrefetchScalarGridSpec(
            num_scalar_prefetch=0,
            grid=(grid_blocks,),
            in_specs=[
                pl.BlockSpec((M, dim), lambda g: (g, 0)),   # x rows for this batch block
                const((dim, inner)), const((1, inner)),     # Wq, bq
                const((dim, inner)), const((1, inner)),     # Wk, bk
                const((dim, inner)), const((1, inner)),     # Wv, bv
                const((inner, dim)), const((1, dim)),       # Wo, bo
            ],
            out_specs=pl.BlockSpec((M, dim), lambda g: (g, 0)),
        ),
        compiler_params=pltpu.CompilerParams(
            dimension_semantics=("parallel",),
            vmem_limit_bytes=32 * 1024 * 1024,
        ),
    )(x2, wq_b, bq, wk_b, bk, wv_b, bv, wo_b, bo)

    return out.reshape(B, N, dim)


def reference_forward(x, params, heads, dim_head):
    """Pure-JAX (f32) reference for correctness check."""
    wq, bq, wk, bk, wv, bv, wo, bo = params
    B, N, dim = x.shape
    scale = 1.0 / math.sqrt(dim_head)
    q = x @ wq + bq[0]
    k = x @ wk + bk[0]
    v = x @ wv + bv[0]

    def split(t):  # (B, N, h*dh) -> (B, h, N, dh)
        return t.reshape(B, N, heads, dim_head).transpose(0, 2, 1, 3)

    q, k, v = split(q), split(k), split(v)
    scores = jnp.einsum('bhid,bhjd->bhij', q, k) * scale
    attn = jax.nn.softmax(scores, axis=-1)
    out = jnp.einsum('bhij,bhjd->bhid', attn, v)
    out = out.transpose(0, 2, 1, 3).reshape(B, N, heads * dim_head)
    return out @ wo + bo[0]


if __name__ == "__main__":
    # Small shapes consistent with the module: dim=32, heads=4, dim_head=8, seq=8, batch=4
    # (batch=4 so the batch-folding inside a grid step is actually exercised: bb=2, M=16).
    B, N, dim = 4, 8, 32
    heads, dim_head = 4, 8
    inner = heads * dim_head

    key = jax.random.PRNGKey(0)
    ks = jax.random.split(key, 9)
    s = 0.1
    x  = jax.random.normal(ks[0], (B, N, dim), dtype=jnp.float32)
    wq = jax.random.normal(ks[1], (dim, inner), dtype=jnp.float32) * s
    bq = jax.random.normal(ks[2], (1, inner), dtype=jnp.float32) * s
    wk = jax.random.normal(ks[3], (dim, inner), dtype=jnp.float32) * s
    bk = jax.random.normal(ks[4], (1, inner), dtype=jnp.float32) * s
    wv = jax.random.normal(ks[5], (dim, inner), dtype=jnp.float32) * s
    bv = jax.random.normal(ks[6], (1, inner), dtype=jnp.float32) * s
    wo = jax.random.normal(ks[7], (inner, dim), dtype=jnp.float32) * s
    bo = jax.random.normal(ks[8], (1, dim), dtype=jnp.float32) * s
    params = (wq, bq, wk, bk, wv, bv, wo, bo)

    ref = reference_forward(x, params, heads, dim_head)

    # Tolerance is 2e-2 because MXU operands are bf16 (f32 accumulation); the f32 reference
    # differs in more than low-order bits at bf16 input precision.
    TOL = dict(atol=2e-2, rtol=2e-2)

    # Default: 2-way "parallel" batch-block grid (keeps both v7x TensorCores busy).
    out = jax.block_until_ready(c_attention_forward(x, params, heads, dim_head))
    assert out.shape == (B, N, dim)
    assert jnp.allclose(out, ref, **TOL), "mismatch vs reference (2-step parallel grid)"

    # Fully-folded single-step variant (whole batch in one projection matmul; best on v5e/v6e).
    out1 = jax.block_until_ready(
        c_attention_forward(x, params, heads, dim_head, grid_blocks=1))
    assert jnp.allclose(out1, ref, **TOL), "mismatch vs reference (single-step grid)"

    print("KERNEL_OK")
</pallas_src>

<mosaic_0001>
module attributes {stable_mosaic.version = 11 : i64} {
  func.func @_attention_kernel(%arg0: i32, %arg1: memref<16x32xf32, #tpu.memory_space<vmem>>, %arg2: memref<32x32xbf16, #tpu.memory_space<vmem>>, %arg3: memref<1x32xf32, #tpu.memory_space<vmem>>, %arg4: memref<32x32xbf16, #tpu.memory_space<vmem>>, %arg5: memref<1x32xf32, #tpu.memory_space<vmem>>, %arg6: memref<32x32xbf16, #tpu.memory_space<vmem>>, %arg7: memref<1x32xf32, #tpu.memory_space<vmem>>, %arg8: memref<32x32xbf16, #tpu.memory_space<vmem>>, %arg9: memref<1x32xf32, #tpu.memory_space<vmem>>, %arg10: memref<16x32xf32, #tpu.memory_space<vmem>>) attributes {dimension_semantics = [#tpu.dimension_semantics<parallel>], iteration_bounds = array<i64: 2>, scalar_prefetch = 0 : i64, scratch_operands = 0 : i64, tpu.core_type = #tpu.core_type<tc>, window_params = [{transform_indices = @transform_0, window_bounds = array<i64: 16, 32>}, {pipeline_mode = #tpu.pipeline_mode<synchronous>, transform_indices = @transform_1, window_bounds = array<i64: 32, 32>}, {pipeline_mode = #tpu.pipeline_mode<synchronous>, transform_indices = @transform_2, window_bounds = array<i64: 1, 32>}, {pipeline_mode = #tpu.pipeline_mode<synchronous>, transform_indices = @transform_3, window_bounds = array<i64: 32, 32>}, {pipeline_mode = #tpu.pipeline_mode<synchronous>, transform_indices = @transform_4, window_bounds = array<i64: 1, 32>}, {pipeline_mode = #tpu.pipeline_mode<synchronous>, transform_indices = @transform_5, window_bounds = array<i64: 32, 32>}, {pipeline_mode = #tpu.pipeline_mode<synchronous>, transform_indices = @transform_6, window_bounds = array<i64: 1, 32>}, {pipeline_mode = #tpu.pipeline_mode<synchronous>, transform_indices = @transform_7, window_bounds = array<i64: 32, 32>}, {pipeline_mode = #tpu.pipeline_mode<synchronous>, transform_indices = @transform_8, window_bounds = array<i64: 1, 32>}, {transform_indices = @transform_9, window_bounds = array<i64: 16, 32>}]} {
    %c0 = arith.constant 0 : index
    %c0_0 = arith.constant 0 : index
    %0 = vector.load %arg1[%c0, %c0_0] : memref<16x32xf32, #tpu.memory_space<vmem>>, vector<16x32xf32>
    %1 = arith.truncf %0 : vector<16x32xf32> to vector<16x32xbf16>
    %c0_1 = arith.constant 0 : index
    %c0_2 = arith.constant 0 : index
    %2 = vector.load %arg2[%c0_1, %c0_2] : memref<32x32xbf16, #tpu.memory_space<vmem>>, vector<32x32xbf16>
    %cst = arith.constant dense<0.000000e+00> : vector<16x32xf32>
    %3 = tpu.matmul %1, %2, %cst {dimension_numbers = #tpu.dot_dimension_numbers<[1], [0], [0], [1], [0, 0, 1, 1], [], []>} : vector<16x32xbf16>, vector<32x32xbf16>, vector<16x32xf32> -> vector<16x32xf32>
    %c0_3 = arith.constant 0 : index
    %c0_4 = arith.constant 0 : index
    %4 = vector.load %arg3[%c0_3, %c0_4] : memref<1x32xf32, #tpu.memory_space<vmem>>, vector<1x32xf32>
    %5 = vector.shape_cast %4 : vector<1x32xf32> to vector<32xf32>
    %6 = vector.shape_cast %5 : vector<32xf32> to vector<1x32xf32>
    %7 = vector.broadcast %6 : vector<1x32xf32> to vector<16x32xf32>
    %8 = arith.addf %3, %7 : vector<16x32xf32>
    %c0_5 = arith.constant 0 : index
    %c0_6 = arith.constant 0 : index
    %9 = vector.load %arg4[%c0_5, %c0_6] : memref<32x32xbf16, #tpu.memory_space<vmem>>, vector<32x32xbf16>
    %cst_7 = arith.constant dense<0.000000e+00> : vector<16x32xf32>
    %10 = tpu.matmul %1, %9, %cst_7 {dimension_numbers = #tpu.dot_dimension_numbers<[1], [0], [0], [1], [0, 0, 1, 1], [], []>} : vector<16x32xbf16>, vector<32x32xbf16>, vector<16x32xf32> -> vector<16x32xf32>
    %c0_8 = arith.constant 0 : index
    %c0_9 = arith.constant 0 : index
    %11 = vector.load %arg5[%c0_8, %c0_9] : memref<1x32xf32, #tpu.memory_space<vmem>>, vector<1x32xf32>
    %12 = vector.shape_cast %11 : vector<1x32xf32> to vector<32xf32>
    %13 = vector.shape_cast %12 : vector<32xf32> to vector<1x32xf32>
    %14 = vector.broadcast %13 : vector<1x32xf32> to vector<16x32xf32>
    %15 = arith.addf %10, %14 : vector<16x32xf32>
    %c0_10 = arith.constant 0 : index
    %c0_11 = arith.constant 0 : index
    %16 = vector.load %arg6[%c0_10, %c0_11] : memref<32x32xbf16, #tpu.memory_space<vmem>>, vector<32x32xbf16>
    %cst_12 = arith.constant dense<0.000000e+00> : vector<16x32xf32>
    %17 = tpu.matmul %1, %16, %cst_12 {dimension_numbers = #tpu.dot_dimension_numbers<[1], [0], [0], [1], [0, 0, 1, 1], [], []>} : vector<16x32xbf16>, vector<32x32xbf16>, vector<16x32xf32> -> vector<16x32xf32>
    %c0_13 = arith.constant 0 : index
    %c0_14 = arith.constant 0 : index
    %18 = vector.load %arg7[%c0_13, %c0_14] : memref<1x32xf32, #tpu.memory_space<vmem>>, vector<1x32xf32>
    %19 = vector.shape_cast %18 : vector<1x32xf32> to vector<32xf32>
    %20 = vector.shape_cast %19 : vector<32xf32> to vector<1x32xf32>
    %21 = vector.broadcast %20 : vector<1x32xf32> to vector<16x32xf32>
    %22 = arith.addf %17, %21 : vector<16x32xf32>
    %23 = vector.extract_strided_slice %8 {offsets = [0, 0], sizes = [8, 32], strides = [1, 1]} : vector<16x32xf32> to vector<8x32xf32>
    %24 = vector.extract_strided_slice %15 {offsets = [0, 0], sizes = [8, 32], strides = [1, 1]} : vector<16x32xf32> to vector<8x32xf32>
    %25 = vector.extract_strided_slice %22 {offsets = [0, 0], sizes = [8, 32], strides = [1, 1]} : vector<16x32xf32> to vector<8x32xf32>
    %cst_15 = arith.constant 0.000000e+00 : f32
    %26 = vector.broadcast %cst_15 : f32 to vector<8x32xf32>
    %27 = vector.extract_strided_slice %23 {offsets = [0, 0], sizes = [8, 8], strides = [1, 1]} : vector<8x32xf32> to vector<8x8xf32>
    %28 = arith.truncf %27 : vector<8x8xf32> to vector<8x8xbf16>
    %29 = vector.extract_strided_slice %24 {offsets = [0, 0], sizes = [8, 8], strides = [1, 1]} : vector<8x32xf32> to vector<8x8xf32>
    %30 = arith.truncf %29 : vector<8x8xf32> to vector<8x8xbf16>
    %31 = vector.extract_strided_slice %25 {offsets = [0, 0], sizes = [8, 8], strides = [1, 1]} : vector<8x32xf32> to vector<8x8xf32>
    %32 = arith.truncf %31 : vector<8x8xf32> to vector<8x8xbf16>
    %cst_16 = arith.constant dense<0.000000e+00> : vector<8x8xf32>
    %33 = tpu.matmul %28, %30, %cst_16 {dimension_numbers = #tpu.dot_dimension_numbers<[1], [1], [0], [0], [0, 0, 1, 0], [], []>} : vector<8x8xbf16>, vector<8x8xbf16>, vector<8x8xf32> -> vector<8x8xf32>
    %cst_17 = arith.constant 0.353553385 : f32
    %34 = vector.broadcast %cst_17 : f32 to vector<8x8xf32>
    %35 = arith.mulf %33, %34 : vector<8x8xf32>
    %cst_18 = arith.constant dense<0xFF800000> : vector<8xf32>
    %36 = vector.multi_reduction <maximumf>, %35, %cst_18 [1] : vector<8x8xf32> to vector<8xf32>
    %37 = vector.shape_cast %36 : vector<8xf32> to vector<8x1xf32>
    %38 = vector.broadcast %37 : vector<8x1xf32> to vector<8x8xf32>
    %39 = arith.subf %35, %38 : vector<8x8xf32>
    %40 = math.exp %39 : vector<8x8xf32>
    %cst_19 = arith.constant dense<0.000000e+00> : vector<8xf32>
    %41 = vector.multi_reduction <add>, %40, %cst_19 [1] : vector<8x8xf32> to vector<8xf32>
    %42 = vector.shape_cast %41 : vector<8xf32> to vector<8x1xf32>
    %43 = tpu.reciprocal %42 {approx = true} : vector<8x1xf32> -> vector<8x1xf32>
    %44 = vector.broadcast %43 : vector<8x1xf32> to vector<8x8xf32>
    %45 = arith.mulf %40, %44 : vector<8x8xf32>
    %46 = arith.truncf %45 : vector<8x8xf32> to vector<8x8xbf16>
    %cst_20 = arith.constant dense<0.000000e+00> : vector<8x8xf32>
    %47 = tpu.matmul %46, %32, %cst_20 {dimension_numbers = #tpu.dot_dimension_numbers<[1], [0], [0], [1], [0, 0, 1, 1], [], []>} : vector<8x8xbf16>, vector<8x8xbf16>, vector<8x8xf32> -> vector<8x8xf32>
    %48 = arith.truncf %47 : vector<8x8xf32> to vector<8x8xbf16>
    %c0_21 = arith.constant 0 : index
    %c0_22 = arith.constant 0 : index
    %49 = vector.load %arg8[%c0_21, %c0_22] : memref<32x32xbf16, #tpu.memory_space<vmem>>, vector<8x32xbf16>
    %cst_23 = arith.constant dense<0.000000e+00> : vector<8x32xf32>
    %50 = tpu.matmul %48, %49, %cst_23 {dimension_numbers = #tpu.dot_dimension_numbers<[1], [0], [0], [1], [0, 0, 1, 1], [], []>} : vector<8x8xbf16>, vector<8x32xbf16>, vector<8x32xf32> -> vector<8x32xf32>
    %51 = arith.addf %26, %50 : vector<8x32xf32>
    %52 = vector.extract_strided_slice %23 {offsets = [0, 8], sizes = [8, 8], strides = [1, 1]} : vector<8x32xf32> to vector<8x8xf32>
    %53 = arith.truncf %52 : vector<8x8xf32> to vector<8x8xbf16>
    %54 = vector.extract_strided_slice %24 {offsets = [0, 8], sizes = [8, 8], strides = [1, 1]} : vector<8x32xf32> to vector<8x8xf32>
    %55 = arith.truncf %54 : vector<8x8xf32> to vector<8x8xbf16>
    %56 = vector.extract_strided_slice %25 {offsets = [0, 8], sizes = [8, 8], strides = [1, 1]} : vector<8x32xf32> to vector<8x8xf32>
    %57 = arith.truncf %56 : vector<8x8xf32> to vector<8x8xbf16>
    %cst_24 = arith.constant dense<0.000000e+00> : vector<8x8xf32>
    %58 = tpu.matmul %53, %55, %cst_24 {dimension_numbers = #tpu.dot_dimension_numbers<[1], [1], [0], [0], [0, 0, 1, 0], [], []>} : vector<8x8xbf16>, vector<8x8xbf16>, vector<8x8xf32> -> vector<8x8xf32>
    %cst_25 = arith.constant 0.353553385 : f32
    %59 = vector.broadcast %cst_25 : f32 to vector<8x8xf32>
    %60 = arith.mulf %58, %59 : vector<8x8xf32>
    %cst_26 = arith.constant dense<0xFF800000> : vector<8xf32>
    %61 = vector.multi_reduction <maximumf>, %60, %cst_26 [1] : vector<8x8xf32> to vector<8xf32>
    %62 = vector.shape_cast %61 : vector<8xf32> to vector<8x1xf32>
    %63 = vector.broadcast %62 : vector<8x1xf32> to vector<8x8xf32>
    %64 = arith.subf %60, %63 : vector<8x8xf32>
    %65 = math.exp %64 : vector<8x8xf32>
    %cst_27 = arith.constant dense<0.000000e+00> : vector<8xf32>
    %66 = vector.multi_reduction <add>, %65, %cst_27 [1] : vector<8x8xf32> to vector<8xf32>
    %67 = vector.shape_cast %66 : vector<8xf32> to vector<8x1xf32>
    %68 = tpu.reciprocal %67 {approx = true} : vector<8x1xf32> -> vector<8x1xf32>
    %69 = vector.broadcast %68 : vector<8x1xf32> to vector<8x8xf32>
    %70 = arith.mulf %65, %69 : vector<8x8xf32>
    %71 = arith.truncf %70 : vector<8x8xf32> to vector<8x8xbf16>
    %cst_28 = arith.constant dense<0.000000e+00> : vector<8x8xf32>
    %72 = tpu.matmul %71, %57, %cst_28 {dimension_numbers = #tpu.dot_dimension_numbers<[1], [0], [0], [1], [0, 0, 1, 1], [], []>} : vector<8x8xbf16>, vector<8x8xbf16>, vector<8x8xf32> -> vector<8x8xf32>
    %73 = arith.truncf %72 : vector<8x8xf32> to vector<8x8xbf16>
    %c8 = arith.constant 8 : index
    %c0_29 = arith.constant 0 : index
    %74 = vector.load %arg8[%c8, %c0_29] : memref<32x32xbf16, #tpu.memory_space<vmem>>, vector<8x32xbf16>
    %cst_30 = arith.constant dense<0.000000e+00> : vector<8x32xf32>
    %75 = tpu.matmul %73, %74, %cst_30 {dimension_numbers = #tpu.dot_dimension_numbers<[1], [0], [0], [1], [0, 0, 1, 1], [], []>} : vector<8x8xbf16>, vector<8x32xbf16>, vector<8x32xf32> -> vector<8x32xf32>
    %76 = arith.addf %51, %75 : vector<8x32xf32>
    %77 = vector.extract_strided_slice %23 {offsets = [0, 16], sizes = [8, 8], strides = [1, 1]} : vector<8x32xf32> to vector<8x8xf32>
    %78 = arith.truncf %77 : vector<8x8xf32> to vector<8x8xbf16>
    %79 = vector.extract_strided_slice %24 {offsets = [0, 16], sizes = [8, 8], strides = [1, 1]} : vector<8x32xf32> to vector<8x8xf32>
    %80 = arith.truncf %79 : vector<8x8xf32> to vector<8x8xbf16>
    %81 = vector.extract_strided_slice %25 {offsets = [0, 16], sizes = [8, 8], strides = [1, 1]} : vector<8x32xf32> to vector<8x8xf32>
    %82 = arith.truncf %81 : vector<8x8xf32> to vector<8x8xbf16>
    %cst_31 = arith.constant dense<0.000000e+00> : vector<8x8xf32>
    %83 = tpu.matmul %78, %80, %cst_31 {dimension_numbers = #tpu.dot_dimension_numbers<[1], [1], [0], [0], [0, 0, 1, 0], [], []>} : vector<8x8xbf16>, vector<8x8xbf16>, vector<8x8xf32> -> vector<8x8xf32>
    %cst_32 = arith.constant 0.353553385 : f32
    %84 = vector.broadcast %cst_32 : f32 to vector<8x8xf32>
    %85 = arith.mulf %83, %84 : vector<8x8xf32>
    %cst_33 = arith.constant dense<0xFF800000> : vector<8xf32>
    %86 = vector.multi_reduction <maximumf>, %85, %cst_33 [1] : vector<8x8xf32> to vector<8xf32>
    %87 = vector.shape_cast %86 : vector<8xf32> to vector<8x1xf32>
    %88 = vector.broadcast %87 : vector<8x1xf32> to vector<8x8xf32>
    %89 = arith.subf %85, %88 : vector<8x8xf32>
    %90 = math.exp %89 : vector<8x8xf32>
    %cst_34 = arith.constant dense<0.000000e+00> : vector<8xf32>
    %91 = vector.multi_reduction <add>, %90, %cst_34 [1] : vector<8x8xf32> to vector<8xf32>
    %92 = vector.shape_cast %91 : vector<8xf32> to vector<8x1xf32>
    %93 = tpu.reciprocal %92 {approx = true} : vector<8x1xf32> -> vector<8x1xf32>
    %94 = vector.broadcast %93 : vector<8x1xf32> to vector<8x8xf32>
    %95 = arith.mulf %90, %94 : vector<8x8xf32>
    %96 = arith.truncf %95 : vector<8x8xf32> to vector<8x8xbf16>
    %cst_35 = arith.constant dense<0.000000e+00> : vector<8x8xf32>
    %97 = tpu.matmul %96, %82, %cst_35 {dimension_numbers = #tpu.dot_dimension_numbers<[1], [0], [0], [1], [0, 0, 1, 1], [], []>} : vector<8x8xbf16>, vector<8x8xbf16>, vector<8x8xf32> -> vector<8x8xf32>
    %98 = arith.truncf %97 : vector<8x8xf32> to vector<8x8xbf16>
    %c16 = arith.constant 16 : index
    %c0_36 = arith.constant 0 : index
    %99 = vector.load %arg8[%c16, %c0_36] : memref<32x32xbf16, #tpu.memory_space<vmem>>, vector<8x32xbf16>
    %cst_37 = arith.constant dense<0.000000e+00> : vector<8x32xf32>
    %100 = tpu.matmul %98, %99, %cst_37 {dimension_numbers = #tpu.dot_dimension_numbers<[1], [0], [0], [1], [0, 0, 1, 1], [], []>} : vector<8x8xbf16>, vector<8x32xbf16>, vector<8x32xf32> -> vector<8x32xf32>
    %101 = arith.addf %76, %100 : vector<8x32xf32>
    %102 = vector.extract_strided_slice %23 {offsets = [0, 24], sizes = [8, 8], strides = [1, 1]} : vector<8x32xf32> to vector<8x8xf32>
    %103 = arith.truncf %102 : vector<8x8xf32> to vector<8x8xbf16>
    %104 = vector.extract_strided_slice %24 {offsets = [0, 24], sizes = [8, 8], strides = [1, 1]} : vector<8x32xf32> to vector<8x8xf32>
    %105 = arith.truncf %104 : vector<8x8xf32> to vector<8x8xbf16>
    %106 = vector.extract_strided_slice %25 {offsets = [0, 24], sizes = [8, 8], strides = [1, 1]} : vector<8x32xf32> to vector<8x8xf32>
    %107 = arith.truncf %106 : vector<8x8xf32> to vector<8x8xbf16>
    %cst_38 = arith.constant dense<0.000000e+00> : vector<8x8xf32>
    %108 = tpu.matmul %103, %105, %cst_38 {dimension_numbers = #tpu.dot_dimension_numbers<[1], [1], [0], [0], [0, 0, 1, 0], [], []>} : vector<8x8xbf16>, vector<8x8xbf16>, vector<8x8xf32> -> vector<8x8xf32>
    %cst_39 = arith.constant 0.353553385 : f32
    %109 = vector.broadcast %cst_39 : f32 to vector<8x8xf32>
    %110 = arith.mulf %108, %109 : vector<8x8xf32>
    %cst_40 = arith.constant dense<0xFF800000> : vector<8xf32>
    %111 = vector.multi_reduction <maximumf>, %110, %cst_40 [1] : vector<8x8xf32> to vector<8xf32>
    %112 = vector.shape_cast %111 : vector<8xf32> to vector<8x1xf32>
    %113 = vector.broadcast %112 : vector<8x1xf32> to vector<8x8xf32>
    %114 = arith.subf %110, %113 : vector<8x8xf32>
    %115 = math.exp %114 : vector<8x8xf32>
    %cst_41 = arith.constant dense<0.000000e+00> : vector<8xf32>
    %116 = vector.multi_reduction <add>, %115, %cst_41 [1] : vector<8x8xf32> to vector<8xf32>
    %117 = vector.shape_cast %116 : vector<8xf32> to vector<8x1xf32>
    %118 = tpu.reciprocal %117 {approx = true} : vector<8x1xf32> -> vector<8x1xf32>
    %119 = vector.broadcast %118 : vector<8x1xf32> to vector<8x8xf32>
    %120 = arith.mulf %115, %119 : vector<8x8xf32>
    %121 = arith.truncf %120 : vector<8x8xf32> to vector<8x8xbf16>
    %cst_42 = arith.constant dense<0.000000e+00> : vector<8x8xf32>
    %122 = tpu.matmul %121, %107, %cst_42 {dimension_numbers = #tpu.dot_dimension_numbers<[1], [0], [0], [1], [0, 0, 1, 1], [], []>} : vector<8x8xbf16>, vector<8x8xbf16>, vector<8x8xf32> -> vector<8x8xf32>
    %123 = arith.truncf %122 : vector<8x8xf32> to vector<8x8xbf16>
    %c24 = arith.constant 24 : index
    %c0_43 = arith.constant 0 : index
    %124 = vector.load %arg8[%c24, %c0_43] : memref<32x32xbf16, #tpu.memory_space<vmem>>, vector<8x32xbf16>
    %cst_44 = arith.constant dense<0.000000e+00> : vector<8x32xf32>
    %125 = tpu.matmul %123, %124, %cst_44 {dimension_numbers = #tpu.dot_dimension_numbers<[1], [0], [0], [1], [0, 0, 1, 1], [], []>} : vector<8x8xbf16>, vector<8x32xbf16>, vector<8x32xf32> -> vector<8x32xf32>
    %126 = arith.addf %101, %125 : vector<8x32xf32>
    %c0_45 = arith.constant 0 : index
    %c0_46 = arith.constant 0 : index
    %127 = vector.load %arg9[%c0_45, %c0_46] : memref<1x32xf32, #tpu.memory_space<vmem>>, vector<1x32xf32>
    %128 = vector.shape_cast %127 : vector<1x32xf32> to vector<32xf32>
    %129 = vector.shape_cast %128 : vector<32xf32> to vector<1x32xf32>
    %130 = vector.broadcast %129 : vector<1x32xf32> to vector<8x32xf32>
    %131 = arith.addf %126, %130 : vector<8x32xf32>
    %c0_47 = arith.constant 0 : index
    %c0_48 = arith.constant 0 : index
    %132 = vector.load %arg10[%c0_47, %c0_48] : memref<16x32xf32, #tpu.memory_space<vmem>>, vector<8x32xf32>
    tpu.vector_store %arg10[%c0_47, %c0_48], %131 {strides = array<i32>} : memref<16x32xf32, #tpu.memory_space<vmem>>, vector<8x32xf32>,
    %133 = vector.extract_strided_slice %8 {offsets = [8, 0], sizes = [8, 32], strides = [1, 1]} : vector<16x32xf32> to vector<8x32xf32>
    %134 = vector.extract_strided_slice %15 {offsets = [8, 0], sizes = [8, 32], strides = [1, 1]} : vector<16x32xf32> to vector<8x32xf32>
    %135 = vector.extract_strided_slice %22 {offsets = [8, 0], sizes = [8, 32], strides = [1, 1]} : vector<16x32xf32> to vector<8x32xf32>
    %cst_49 = arith.constant 0.000000e+00 : f32
    %136 = vector.broadcast %cst_49 : f32 to vector<8x32xf32>
    %137 = vector.extract_strided_slice %133 {offsets = [0, 0], sizes = [8, 8], strides = [1, 1]} : vector<8x32xf32> to vector<8x8xf32>
    %138 = arith.truncf %137 : vector<8x8xf32> to vector<8x8xbf16>
    %139 = vector.extract_strided_slice %134 {offsets = [0, 0], sizes = [8, 8], strides = [1, 1]} : vector<8x32xf32> to vector<8x8xf32>
    %140 = arith.truncf %139 : vector<8x8xf32> to vector<8x8xbf16>
    %141 = vector.extract_strided_slice %135 {offsets = [0, 0], sizes = [8, 8], strides = [1, 1]} : vector<8x32xf32> to vector<8x8xf32>
    %142 = arith.truncf %141 : vector<8x8xf32> to vector<8x8xbf16>
    %cst_50 = arith.constant dense<0.000000e+00> : vector<8x8xf32>
    %143 = tpu.matmul %138, %140, %cst_50 {dimension_numbers = #tpu.dot_dimension_numbers<[1], [1], [0], [0], [0, 0, 1, 0], [], []>} : vector<8x8xbf16>, vector<8x8xbf16>, vector<8x8xf32> -> vector<8x8xf32>
    %cst_51 = arith.constant 0.353553385 : f32
    %144 = vector.broadcast %cst_51 : f32 to vector<8x8xf32>
    %145 = arith.mulf %143, %144 : vector<8x8xf32>
    %cst_52 = arith.constant dense<0xFF800000> : vector<8xf32>
    %146 = vector.multi_reduction <maximumf>, %145, %cst_52 [1] : vector<8x8xf32> to vector<8xf32>
    %147 = vector.shape_cast %146 : vector<8xf32> to vector<8x1xf32>
    %148 = vector.broadcast %147 : vector<8x1xf32> to vector<8x8xf32>
    %149 = arith.subf %145, %148 : vector<8x8xf32>
    %150 = math.exp %149 : vector<8x8xf32>
    %cst_53 = arith.constant dense<0.000000e+00> : vector<8xf32>
    %151 = vector.multi_reduction <add>, %150, %cst_53 [1] : vector<8x8xf32> to vector<8xf32>
    %152 = vector.shape_cast %151 : vector<8xf32> to vector<8x1xf32>
    %153 = tpu.reciprocal %152 {approx = true} : vector<8x1xf32> -> vector<8x1xf32>
    %154 = vector.broadcast %153 : vector<8x1xf32> to vector<8x8xf32>
    %155 = arith.mulf %150, %154 : vector<8x8xf32>
    %156 = arith.truncf %155 : vector<8x8xf32> to vector<8x8xbf16>
    %cst_54 = arith.constant dense<0.000000e+00> : vector<8x8xf32>
    %157 = tpu.matmul %156, %142, %cst_54 {dimension_numbers = #tpu.dot_dimension_numbers<[1], [0], [0], [1], [0, 0, 1, 1], [], []>} : vector<8x8xbf16>, vector<8x8xbf16>, vector<8x8xf32> -> vector<8x8xf32>
    %158 = arith.truncf %157 : vector<8x8xf32> to vector<8x8xbf16>
    %c0_55 = arith.constant 0 : index
    %c0_56 = arith.constant 0 : index
    %159 = vector.load %arg8[%c0_55, %c0_56] : memref<32x32xbf16, #tpu.memory_space<vmem>>, vector<8x32xbf16>
    %cst_57 = arith.constant dense<0.000000e+00> : vector<8x32xf32>
    %160 = tpu.matmul %158, %159, %cst_57 {dimension_numbers = #tpu.dot_dimension_numbers<[1], [0], [0], [1], [0, 0, 1, 1], [], []>} : vector<8x8xbf16>, vector<8x32xbf16>, vector<8x32xf32> -> vector<8x32xf32>
    %161 = arith.addf %136, %160 : vector<8x32xf32>
    %162 = vector.extract_strided_slice %133 {offsets = [0, 8], sizes = [8, 8], strides = [1, 1]} : vector<8x32xf32> to vector<8x8xf32>
    %163 = arith.truncf %162 : vector<8x8xf32> to vector<8x8xbf16>
    %164 = vector.extract_strided_slice %134 {offsets = [0, 8], sizes = [8, 8], strides = [1, 1]} : vector<8x32xf32> to vector<8x8xf32>
    %165 = arith.truncf %164 : vector<8x8xf32> to vector<8x8xbf16>
    %166 = vector.extract_strided_slice %135 {offsets = [0, 8], sizes = [8, 8], strides = [1, 1]} : vector<8x32xf32> to vector<8x8xf32>
    %167 = arith.truncf %166 : vector<8x8xf32> to vector<8x8xbf16>
    %cst_58 = arith.constant dense<0.000000e+00> : vector<8x8xf32>
    %168 = tpu.matmul %163, %165, %cst_58 {dimension_numbers = #tpu.dot_dimension_numbers<[1], [1], [0], [0], [0, 0, 1, 0], [], []>} : vector<8x8xbf16>, vector<8x8xbf16>, vector<8x8xf32> -> vector<8x8xf32>
    %cst_59 = arith.constant 0.353553385 : f32
    %169 = vector.broadcast %cst_59 : f32 to vector<8x8xf32>
    %170 = arith.mulf %168, %169 : vector<8x8xf32>
    %cst_60 = arith.constant dense<0xFF800000> : vector<8xf32>
    %171 = vector.multi_reduction <maximumf>, %170, %cst_60 [1] : vector<8x8xf32> to vector<8xf32>
    %172 = vector.shape_cast %171 : vector<8xf32> to vector<8x1xf32>
    %173 = vector.broadcast %172 : vector<8x1xf32> to vector<8x8xf32>
    %174 = arith.subf %170, %173 : vector<8x8xf32>
    %175 = math.exp %174 : vector<8x8xf32>
    %cst_61 = arith.constant dense<0.000000e+00> : vector<8xf32>
    %176 = vector.multi_reduction <add>, %175, %cst_61 [1] : vector<8x8xf32> to vector<8xf32>
    %177 = vector.shape_cast %176 : vector<8xf32> to vector<8x1xf32>
    %178 = tpu.reciprocal %177 {approx = true} : vector<8x1xf32> -> vector<8x1xf32>
    %179 = vector.broadcast %178 : vector<8x1xf32> to vector<8x8xf32>
    %180 = arith.mulf %175, %179 : vector<8x8xf32>
    %181 = arith.truncf %180 : vector<8x8xf32> to vector<8x8xbf16>
    %cst_62 = arith.constant dense<0.000000e+00> : vector<8x8xf32>
    %182 = tpu.matmul %181, %167, %cst_62 {dimension_numbers = #tpu.dot_dimension_numbers<[1], [0], [0], [1], [0, 0, 1, 1], [], []>} : vector<8x8xbf16>, vector<8x8xbf16>, vector<8x8xf32> -> vector<8x8xf32>
    %183 = arith.truncf %182 : vector<8x8xf32> to vector<8x8xbf16>
    %c8_63 = arith.constant 8 : index
    %c0_64 = arith.constant 0 : index
    %184 = vector.load %arg8[%c8_63, %c0_64] : memref<32x32xbf16, #tpu.memory_space<vmem>>, vector<8x32xbf16>
    %cst_65 = arith.constant dense<0.000000e+00> : vector<8x32xf32>
    %185 = tpu.matmul %183, %184, %cst_65 {dimension_numbers = #tpu.dot_dimension_numbers<[1], [0], [0], [1], [0, 0, 1, 1], [], []>} : vector<8x8xbf16>, vector<8x32xbf16>, vector<8x32xf32> -> vector<8x32xf32>
    %186 = arith.addf %161, %185 : vector<8x32xf32>
    %187 = vector.extract_strided_slice %133 {offsets = [0, 16], sizes = [8, 8], strides = [1, 1]} : vector<8x32xf32> to vector<8x8xf32>
    %188 = arith.truncf %187 : vector<8x8xf32> to vector<8x8xbf16>
    %189 = vector.extract_strided_slice %134 {offsets = [0, 16], sizes = [8, 8], strides = [1, 1]} : vector<8x32xf32> to vector<8x8xf32>
    %190 = arith.truncf %189 : vector<8x8xf32> to vector<8x8xbf16>
    %191 = vector.extract_strided_slice %135 {offsets = [0, 16], sizes = [8, 8], strides = [1, 1]} : vector<8x32xf32> to vector<8x8xf32>
    %192 = arith.truncf %191 : vector<8x8xf32> to vector<8x8xbf16>
    %cst_66 = arith.constant dense<0.000000e+00> : vector<8x8xf32>
    %193 = tpu.matmul %188, %190, %cst_66 {dimension_numbers = #tpu.dot_dimension_numbers<[1], [1], [0], [0], [0, 0, 1, 0], [], []>} : vector<8x8xbf16>, vector<8x8xbf16>, vector<8x8xf32> -> vector<8x8xf32>
    %cst_67 = arith.constant 0.353553385 : f32
    %194 = vector.broadcast %cst_67 : f32 to vector<8x8xf32>
    %195 = arith.mulf %193, %194 : vector<8x8xf32>
    %cst_68 = arith.constant dense<0xFF800000> : vector<8xf32>
    %196 = vector.multi_reduction <maximumf>, %195, %cst_68 [1] : vector<8x8xf32> to vector<8xf32>
    %197 = vector.shape_cast %196 : vector<8xf32> to vector<8x1xf32>
    %198 = vector.broadcast %197 : vector<8x1xf32> to vector<8x8xf32>
    %199 = arith.subf %195, %198 : vector<8x8xf32>
    %200 = math.exp %199 : vector<8x8xf32>
    %cst_69 = arith.constant dense<0.000000e+00> : vector<8xf32>
    %201 = vector.multi_reduction <add>, %200, %cst_69 [1] : vector<8x8xf32> to vector<8xf32>
    %202 = vector.shape_cast %201 : vector<8xf32> to vector<8x1xf32>
    %203 = tpu.reciprocal %202 {approx = true} : vector<8x1xf32> -> vector<8x1xf32>
    %204 = vector.broadcast %203 : vector<8x1xf32> to vector<8x8xf32>
    %205 = arith.mulf %200, %204 : vector<8x8xf32>
    %206 = arith.truncf %205 : vector<8x8xf32> to vector<8x8xbf16>
    %cst_70 = arith.constant dense<0.000000e+00> : vector<8x8xf32>
    %207 = tpu.matmul %206, %192, %cst_70 {dimension_numbers = #tpu.dot_dimension_numbers<[1], [0], [0], [1], [0, 0, 1, 1], [], []>} : vector<8x8xbf16>, vector<8x8xbf16>, vector<8x8xf32> -> vector<8x8xf32>
    %208 = arith.truncf %207 : vector<8x8xf32> to vector<8x8xbf16>
    %c16_71 = arith.constant 16 : index
    %c0_72 = arith.constant 0 : index
    %209 = vector.load %arg8[%c16_71, %c0_72] : memref<32x32xbf16, #tpu.memory_space<vmem>>, vector<8x32xbf16>
    %cst_73 = arith.constant dense<0.000000e+00> : vector<8x32xf32>
    %210 = tpu.matmul %208, %209, %cst_73 {dimension_numbers = #tpu.dot_dimension_numbers<[1], [0], [0], [1], [0, 0, 1, 1], [], []>} : vector<8x8xbf16>, vector<8x32xbf16>, vector<8x32xf32> -> vector<8x32xf32>
    %211 = arith.addf %186, %210 : vector<8x32xf32>
    %212 = vector.extract_strided_slice %133 {offsets = [0, 24], sizes = [8, 8], strides = [1, 1]} : vector<8x32xf32> to vector<8x8xf32>
    %213 = arith.truncf %212 : vector<8x8xf32> to vector<8x8xbf16>
    %214 = vector.extract_strided_slice %134 {offsets = [0, 24], sizes = [8, 8], strides = [1, 1]} : vector<8x32xf32> to vector<8x8xf32>
    %215 = arith.truncf %214 : vector<8x8xf32> to vector<8x8xbf16>
    %216 = vector.extract_strided_slice %135 {offsets = [0, 24], sizes = [8, 8], strides = [1, 1]} : vector<8x32xf32> to vector<8x8xf32>
    %217 = arith.truncf %216 : vector<8x8xf32> to vector<8x8xbf16>
    %cst_74 = arith.constant dense<0.000000e+00> : vector<8x8xf32>
    %218 = tpu.matmul %213, %215, %cst_74 {dimension_numbers = #tpu.dot_dimension_numbers<[1], [1], [0], [0], [0, 0, 1, 0], [], []>} : vector<8x8xbf16>, vector<8x8xbf16>, vector<8x8xf32> -> vector<8x8xf32>
    %cst_75 = arith.constant 0.353553385 : f32
    %219 = vector.broadcast %cst_75 : f32 to vector<8x8xf32>
    %220 = arith.mulf %218, %219 : vector<8x8xf32>
    %cst_76 = arith.constant dense<0xFF800000> : vector<8xf32>
    %221 = vector.multi_reduction <maximumf>, %220, %cst_76 [1] : vector<8x8xf32> to vector<8xf32>
    %222 = vector.shape_cast %221 : vector<8xf32> to vector<8x1xf32>
    %223 = vector.broadcast %222 : vector<8x1xf32> to vector<8x8xf32>
    %224 = arith.subf %220, %223 : vector<8x8xf32>
    %225 = math.exp %224 : vector<8x8xf32>
    %cst_77 = arith.constant dense<0.000000e+00> : vector<8xf32>
    %226 = vector.multi_reduction <add>, %225, %cst_77 [1] : vector<8x8xf32> to vector<8xf32>
    %227 = vector.shape_cast %226 : vector<8xf32> to vector<8x1xf32>
    %228 = tpu.reciprocal %227 {approx = true} : vector<8x1xf32> -> vector<8x1xf32>
    %229 = vector.broadcast %228 : vector<8x1xf32> to vector<8x8xf32>
    %230 = arith.mulf %225, %229 : vector<8x8xf32>
    %231 = arith.truncf %230 : vector<8x8xf32> to vector<8x8xbf16>
    %cst_78 = arith.constant dense<0.000000e+00> : vector<8x8xf32>
    %232 = tpu.matmul %231, %217, %cst_78 {dimension_numbers = #tpu.dot_dimension_numbers<[1], [0], [0], [1], [0, 0, 1, 1], [], []>} : vector<8x8xbf16>, vector<8x8xbf16>, vector<8x8xf32> -> vector<8x8xf32>
    %233 = arith.truncf %232 : vector<8x8xf32> to vector<8x8xbf16>
    %c24_79 = arith.constant 24 : index
    %c0_80 = arith.constant 0 : index
    %234 = vector.load %arg8[%c24_79, %c0_80] : memref<32x32xbf16, #tpu.memory_space<vmem>>, vector<8x32xbf16>
    %cst_81 = arith.constant dense<0.000000e+00> : vector<8x32xf32>
    %235 = tpu.matmul %233, %234, %cst_81 {dimension_numbers = #tpu.dot_dimension_numbers<[1], [0], [0], [1], [0, 0, 1, 1], [], []>} : vector<8x8xbf16>, vector<8x32xbf16>, vector<8x32xf32> -> vector<8x32xf32>
    %236 = arith.addf %211, %235 : vector<8x32xf32>
    %c0_82 = arith.constant 0 : index
    %c0_83 = arith.constant 0 : index
    %237 = vector.load %arg9[%c0_82, %c0_83] : memref<1x32xf32, #tpu.memory_space<vmem>>, vector<1x32xf32>
    %238 = vector.shape_cast %237 : vector<1x32xf32> to vector<32xf32>
    %239 = vector.shape_cast %238 : vector<32xf32> to vector<1x32xf32>
    %240 = vector.broadcast %239 : vector<1x32xf32> to vector<8x32xf32>
    %241 = arith.addf %236, %240 : vector<8x32xf32>
    %c8_84 = arith.constant 8 : index
    %c0_85 = arith.constant 0 : index
    %242 = vector.load %arg10[%c8_84, %c0_85] : memref<16x32xf32, #tpu.memory_space<vmem>>, vector<8x32xf32>
    tpu.vector_store %arg10[%c8_84, %c0_85], %241 {strides = array<i32>} : memref<16x32xf32, #tpu.memory_space<vmem>>, vector<8x32xf32>,
    return
  }
  func.func @transform_0(%arg0: i32) -> (i32, i32) {
    %c0_i32 = arith.constant 0 : i32
    %c0_i32_0 = arith.constant 0 : i32
    return %arg0, %c0_i32 : i32, i32
  }
  func.func @transform_1(%arg0: i32) -> (i32, i32) {
    %c0_i32 = arith.constant 0 : i32
    %c0_i32_0 = arith.constant 0 : i32
    %c0_i32_1 = arith.constant 0 : i32
    return %c0_i32, %c0_i32_0 : i32, i32
  }
  func.func @transform_2(%arg0: i32) -> (i32, i32) {
    %c0_i32 = arith.constant 0 : i32
    %c0_i32_0 = arith.constant 0 : i32
    %c0_i32_1 = arith.constant 0 : i32
    return %c0_i32, %c0_i32_0 : i32, i32
  }
  func.func @transform_3(%arg0: i32) -> (i32, i32) {
    %c0_i32 = arith.constant 0 : i32
    %c0_i32_0 = arith.constant 0 : i32
    %c0_i32_1 = arith.constant 0 : i32
    return %c0_i32, %c0_i32_0 : i32, i32
  }
  func.func @transform_4(%arg0: i32) -> (i32, i32) {
    %c0_i32 = arith.constant 0 : i32
    %c0_i32_0 = arith.constant 0 : i32
    %c0_i32_1 = arith.constant 0 : i32
    return %c0_i32, %c0_i32_0 : i32, i32
  }
  func.func @transform_5(%arg0: i32) -> (i32, i32) {
    %c0_i32 = arith.constant 0 : i32
    %c0_i32_0 = arith.constant 0 : i32
    %c0_i32_1 = arith.constant 0 : i32
    return %c0_i32, %c0_i32_0 : i32, i32
  }
  func.func @transform_6(%arg0: i32) -> (i32, i32) {
    %c0_i32 = arith.constant 0 : i32
    %c0_i32_0 = arith.constant 0 : i32
    %c0_i32_1 = arith.constant 0 : i32
    return %c0_i32, %c0_i32_0 : i32, i32
  }
  func.func @transform_7(%arg0: i32) -> (i32, i32) {
    %c0_i32 = arith.constant 0 : i32
    %c0_i32_0 = arith.constant 0 : i32
    %c0_i32_1 = arith.constant 0 : i32
    return %c0_i32, %c0_i32_0 : i32, i32
  }
  func.func @transform_8(%arg0: i32) -> (i32, i32) {
    %c0_i32 = arith.constant 0 : i32
    %c0_i32_0 = arith.constant 0 : i32
    %c0_i32_1 = arith.constant 0 : i32
    return %c0_i32, %c0_i32_0 : i32, i32
  }
  func.func @transform_9(%arg0: i32) -> (i32, i32) {
    %c0_i32 = arith.constant 0 : i32
    %c0_i32_0 = arith.constant 0 : i32
    return %arg0, %c0_i32 : i32, i32
  }
}

</mosaic_0001>

<bundles_post_ra>
// kernel: tpu_custom_call.1
= control target key start
LH: loop header
LB: loop body
LE: loop exit
PB: predicated region body
PF: predicated region fallthrough
CT: control target
= control target key end

     0   :  { %s3203_s0 = inlined_call_operand.hbm [shape: f32[32,32], index: 0, kind: input, shape index: {}]   ;;  %s3204_s1 = inlined_call_operand.hbm [shape: bf16[32,32], index: 1, kind: input, shape index: {}]   ;;  %s3205_s2 = inlined_call_operand.vmem [shape: f32[1,32], index: 2, kind: input, shape index: {}]   ;;  %s3206_s3 = inlined_call_operand.hbm [shape: bf16[32,32], index: 3, kind: input, shape index: {}]   ;;  %s3207_s4 = inlined_call_operand.vmem [shape: f32[1,32], index: 4, kind: input, shape index: {}]   ;;  %s3208_s5 = inlined_call_operand.vmem [shape: bf16[32,32], index: 5, kind: input, shape index: {}]   ;;  %s3209_s6 = inlined_call_operand.vmem [shape: f32[1,32], index: 6, kind: input, shape index: {}]   ;;  %s3210_s7 = inlined_call_operand.hbm [shape: bf16[32,32], index: 7, kind: input, shape index: {}]   ;;  %s3211_s8 = inlined_call_operand.vmem [shape: f32[1,32], index: 8, kind: input, shape index: {}]   ;;  %s3212_s9 = inlined_call_operand.hbm [shape: f32[32,32], index: 9, kind: output, shape index: {}]  }
   0x1   :  { %3219 = sst [smem:[#allocation17_spill]] %s3212_s9 }
   0x2   :  { %14 = vsyncpa [#allocation3], 0 }
   0x3   :  { %16 = vsyncpa [#allocation3 + $0x1], 0 }
   0x4   :  { %17 = vsyncpa [#allocation6], 0 }
   0x5   :  { %18 = vsyncpa [#allocation9], 0 }
   0x6   :  { %19 = vsyncpa [#allocation4], 0 }
   0x7   :  { %21 = vsyncpa [#allocation4 + $0x1], 0  ;;  %s2676_s30 = smov 0   ;;  %s2678_s10 = smov 0  }
   0x8   :  { %s2680_s11 = smov 0   ;;  %s2682_s12 = smov 0  }
   0x9 LB: > { %3220 = sst [smem:[#allocation15_spill]] %s2596_s30  ;;  %s2697_s13 = sadd.s32 4294967295, %s2608_s12   ;;  %s2608_s12 = sphi %s2682_s12, %s3244_s12   ;;  %s2604_s11 = sphi %s2680_s11, %s3243_s11   ;;  %s2600_s10 = sphi %s2678_s10, %s3242_s10   ;;  %s2596_s30 = sphi %s2676_s30, %s3241_s30  }
   0xa   : > { %s2009_s14 = sadd.s32 4294967294, %s2608_s12   ;;  %p47_p0 = scmp.ne.s32.totalorder %s2600_s10, %s2596_s30 }
   0xb   : > { %p3213_p1 = scmp.eq.s32.totalorder %s2697_s13, 0  ;;  %p245_p3 = scmp.eq.s32.totalorder %s2009_s14, 1 }
   0xc   : > { %p2010_p5 = scmp.ge.s32.totalorder %s2608_s12, 1  ;;  %p252_p7 = scmp.lt.s32.totalorder %s2608_s12, 3 }
   0xd   : > { %p2706_p4 = por %p3213_p1, %p47_p0  ;;  %p2711_p6 = por %p245_p3, %p47_p0 }
   0xe   : > { %p2716_p8 = pnand %p2010_p5, %p252_p7  ;;  %s2610_s18 = smov [#allocation5]  }
   0xf   : > { %s3221_s15 = scalar_select %p2706_p4, 1, 0 }
  0x10   : > { %s3222_s16 = scalar_select %p2711_p6, 1, 0 }
  0x11   : > { %s3224_s17 = scalar_select %p2716_p8, 1, 0 }
  0x12   : > { %3223 = sst [smem:[#allocation16_spill]] %s3222_s16  ;;  %s264_s19 = sshll.u32 %s2610_s18, 4  ;;  %s2720_s19 = int_to_ptr.vmem [resolvable:$true] %s264_s19 }
  0x13   : > { %p2310_p9 = pneg %p2716_p8  ;;  %s2611_s21 = smov [#allocation7]  }
  0x14   : > { %s280_s22 = sshll.u32 %s2611_s21, 4  ;;  %s2612_s23 = smov [#allocation8]   ;;  %s2731_s22 = int_to_ptr.vmem [resolvable:$true] %s280_s22 }
  0x15   : > { %p2727_p11 = pnand %p2310_p9, %p3213_p1  ;;  %s2733_s24 = sshll.u32 %s2612_s23, 4  ;;  %s303_s24 = int_to_ptr.vmem [resolvable:$true] %s2733_s24 }
  0x16   : > { %s2420_s27 = scalar_lea.hbm %s3204_s1, 256 }
  0x17   : > { %p2421_p12 = scmp.ne.s32.totalorder %s3204_s1, %s2420_s27  ;;  %p2743_p13 = pneg %p2727_p11 }
  0x18   : > { %p2427_p5 = scmp.lt.u32.totalorder %s2420_s27, %s3204_s1 }
  0x19   : > { %p2423_p0 = pnand %p2743_p13, %p2421_p12 }
  0x1b   : > { %p2424_p3 = pneg %p2423_p0 }
  0x1d   : > { %p2429_p7 = pnand %p2427_p5, %p2424_p3 }
  0x1f   : > { %2432 = shalt.err (!%p2429_p7)
}
  0x20   : > { %s2433_s23 = scalar_lea.vmem %s2720_s19, 256  ;;  %p2441_p2 = scmp.lt.s32.totalorder %s2720_s19, %s2720_s19 }
  0x21   : > { %p2434_p9 = scmp.ne.s32.totalorder %s2720_s19, %s2433_s23  ;;  %p2442_p6 = scmp.lt.s32.totalorder %s2433_s23, %s2433_s23 }
  0x23   : > { %p2436_p10 = pnand %p2434_p9, %p2743_p13  ;;  %p2443_p12 = por %p2442_p6, %p2441_p2 }
  0x25   : > { %p2437_p1 = pneg %p2436_p10 }
  0x27   : > { %p2444_p0 = pnand %p2443_p12, %p2437_p1 }
  0x29   : > { %2447 = shalt.err (!%p2444_p0)
}
  0x2a   : > { %s2613_s25 = smov 64   ;;  %s2614_s26 = smov 4  }
  0x2b   : > { %2313 = dma.hbm_to_vmem [thread:$0]  (!%p2727_p11), %s3204_s1, 256, %s2720_s19, [#allocation6], %s2613_s25, %s2613_s25, %s2614_s26  }
  0x2c   : > { %s2448_s21 = scalar_lea.hbm %s3206_s3, 256 }
  0x2d   : > { %p2449_p1 = scmp.ne.s32.totalorder %s3206_s3, %s2448_s21  ;;  %p2455_p10 = scmp.lt.u32.totalorder %s2448_s21, %s3206_s3 }
  0x2f   : > { %p2451_p2 = pnand %p2449_p1, %p2743_p13 }
  0x31   : > { %p2452_p6 = pneg %p2451_p2 }
  0x33   : > { %p2457_p3 = pnand %p2455_p10, %p2452_p6 }
  0x35   : > { %2460 = shalt.err (!%p2457_p3)
}
  0x36   : > { %s2461_s19 = scalar_lea.vmem %s2731_s22, 256  ;;  %p2469_p12 = scmp.lt.s32.totalorder %s2731_s22, %s2731_s22 }
  0x37   : > { %p2462_p5 = scmp.ne.s32.totalorder %s2731_s22, %s2461_s19  ;;  %p2470_p0 = scmp.lt.s32.totalorder %s2461_s19, %s2461_s19 }
  0x39   : > { %p2464_p7 = pnand %p2462_p5, %p2743_p13  ;;  %p2471_p1 = por %p2470_p0, %p2469_p12 }
  0x3b   : > { %p2465_p9 = pneg %p2464_p7 }
  0x3d   : > { %p2472_p2 = pnand %p2471_p1, %p2465_p9 }
  0x3f   : > { %2475 = shalt.err (!%p2472_p2)
}
  0x40   : > { %2316 = dma.hbm_to_vmem [thread:$0]  (!%p2727_p11), %s3206_s3, 256, %s2731_s22, [#allocation6], %s2613_s25, %s2613_s25, %s2614_s26  }
  0x41   : > { %s2476_s28 = scalar_lea.hbm %s3210_s7, 256 }
  0x42   : > { %p2477_p6 = scmp.ne.s32.totalorder %s3210_s7, %s2476_s28  ;;  %p2483_p5 = scmp.lt.u32.totalorder %s2476_s28, %s3210_s7 }
  0x44   : > { %p2479_p10 = pnand %p2477_p6, %p2743_p13 }
  0x46   : > { %p2480_p3 = pneg %p2479_p10 }
  0x48   : > { %p2485_p7 = pnand %p2483_p5, %p2480_p3 }
  0x4a   : > { %2488 = shalt.err (!%p2485_p7)
}
  0x4b   : > { %s2489_s19 = scalar_lea.vmem %s303_s24, 256  ;;  %p2497_p1 = scmp.lt.s32.totalorder %s303_s24, %s303_s24 }
  0x4c   : > { %p2490_p9 = scmp.ne.s32.totalorder %s303_s24, %s2489_s19  ;;  %p2498_p2 = scmp.lt.s32.totalorder %s2489_s19, %s2489_s19 }
  0x4e   : > { %p2492_p12 = pnand %p2490_p9, %p2743_p13  ;;  %p2499_p4 = por %p2498_p2, %p2497_p1 }
  0x50   : > { %p2493_p0 = pneg %p2492_p12 }
  0x52   : > { %p2500_p8 = pnand %p2499_p4, %p2493_p0 }
  0x54   : > { %2503 = shalt.err (!%p2500_p8)
}
  0x55   : > { %2319 = dma.hbm_to_vmem [thread:$0]  (!%p2727_p11), %s3210_s7, 256, %s303_s24, [#allocation9], %s2613_s25, %s2613_s25, %s2614_s26  }
  0x56   : > { %s2816_s14 = sadd.s32 1, %s2608_s12   ;;  %s34_s30 = sadd.s32 1, %s2604_s11 }
  0x57   : > { %s31_s20 = ssub.s32 %s2608_s12, %s2816_s14  ;;  %p41_p8 = scmp.ne.s32.totalorder %s2604_s11, %s2600_s10 }
  0x58   : > { %p32_p4 = scmp.eq.s32.totalorder %s31_s20, 0  ;;  %p42_p13 = scmp.eq.s32.totalorder %s2608_s12, 0 }
  0x59   : > { %p2331_p6 = scmp.lt.s32.totalorder %s2608_s12, 2  ;;  %p3227_p3 = scmp.eq.s32.totalorder %s2697_s13, 1 }
  0x5a   : > { %s2826_s16 = scalar_select %p32_p4, %s2604_s11, %s34_s30  }
  0x5b   : > { %p43_p10 = por %p42_p13, %p41_p8  ;;  %p2830_p5 = por %p3227_p3, %p41_p8 }
  0x5c   : > { %s319_s28 = sand.u32 1, %s2604_s11   ;;  %s2067_s29 = sshll.u32 %s2608_s12, 8 }
  0x5d   : > { %s2015_s24 = sshll.u32 %s319_s28, 4  ;;  %s2839_s18 = scalar_lea.hbm %s3203_s0, %s2067_s29 }
  0x5e   : > { %s323_s21 = scalar_lea.vmem [#allocation2], %s2015_s24  ;;  %p2841_p11 = pnand %p2331_p6, %p43_p10 }
  0x5f   : > { %s330_s23 = sshll.u32 %s323_s21, 4  ;;  %s2847_s22 = scalar_lea.sflag [#allocation3], %s319_s28  ;;  %s2845_s23 = int_to_ptr.vmem [resolvable:$true] %s330_s23 }
  0x60   : > { %s2504_s9 = scalar_lea.hbm %s2839_s18, 256  ;;  %p2506_p9 = pneg %p2841_p11 }
  0x61   : > { %p2505_p7 = scmp.ne.s32.totalorder %s2839_s18, %s2504_s9  ;;  %s2509_s29 = scalar_lea.hbm %s3203_s0, 512 }
  0x62   : > { %p2510_p1 = scmp.lt.u32.totalorder %s2839_s18, %s3203_s0  ;;  %p2511_p2 = scmp.lt.u32.totalorder %s2509_s29, %s2504_s9 }
  0x63   : > { %p2507_p12 = pnand %p2506_p9, %p2505_p7  ;;  %p2513_p8 = scmp.lt.u32.totalorder %s2504_s9, %s2839_s18 }
  0x64   : > { %p2512_p4 = por %p2511_p2, %p2510_p1 }
  0x65   : > { %p2508_p0 = pneg %p2507_p12 }
  0x66   : > { %p2514_p13 = por %p2513_p8, %p2512_p4 }
  0x68   : > { %p2515_p6 = pnand %p2514_p13, %p2508_p0 }
  0x6a   : > { %2518 = shalt.err (!%p2515_p6)
}
  0x6b   : > { %s2519_s28 = scalar_lea.vmem %s2845_s23, 256  ;;  %s2615_s26 = smov [#allocation2]  }
  0x6c   : > { %p2520_p10 = scmp.ne.s32.totalorder %s2845_s23, %s2519_s28  ;;  %s2524_s21 = sshll.u32 %s2615_s26, 4  ;;  %s2525_s21 = int_to_ptr.vmem [resolvable:$false] %s2524_s21 }
  0x6d   : > { %s2526_s20 = scalar_lea.vmem %s2525_s21, 512  ;;  %p2527_p12 = scmp.lt.s32.totalorder %s2845_s23, %s2525_s21 }
  0x6e   : > { %p2522_p3 = pnand %p2520_p10, %p2506_p9  ;;  %p2528_p1 = scmp.lt.s32.totalorder %s2526_s20, %s2519_s28 }
  0x70   : > { %p2523_p7 = pneg %p2522_p3  ;;  %p2529_p2 = por %p2528_p1, %p2527_p12 }
  0x72   : > { %p2530_p4 = pnand %p2529_p2, %p2523_p7 }
  0x74   : > { %2533 = shalt.err (!%p2530_p4)
}
  0x75   : > { %s2616_s9 = smov 128   ;;  %s2617_s30 = smov 8  }
  0x76   : > { %2323 = dma.hbm_to_vmem [thread:$0]  (!%p2841_p11), %s2839_s18, 256, %s2845_s23, %s2847_s22, %s2616_s9, %s2616_s9, %s2617_s30  }
  0x77   : > { %p3230_p9 = scmp.ne.s32.totalorder %s3224_s17, 0 }
  0x78   : > { %s2878_s29 = sand.u32 (!%p3230_p9), 1, %s2600_s10   ;;  %p3231_p0 = scmp.ne.s32.totalorder (!%p3230_p9), %s3221_s15, 0 }
  0x79   : > { %342 = sbr.rel (%p3230_p9) target bundleno = 4586 (0x11ea), region = 56  ;;  %s2019_s24 = sshll.u32 (!%p3230_p9), %s2878_s29, 4 }
  0x7a   : > { %s345_s25 = scalar_lea.sflag (!%p3230_p9), [#allocation3], %s2878_s29  ;;  %s348_s28 = scalar_lea.vmem (!%p3230_p9), [#allocation2], %s2019_s24 }
  0x80   : > { %2579 = dma.done.wait (%p3231_p0), %s345_s25, 256  }
  0x81   : > { %2581 = vsyncadd (%p3231_p0), %s345_s25, 4294967040  ;;  %p3232_p11 = scmp.eq.s32.totalorder %s2697_s13, 0 }
  0x83   : > { %2583 = dma.done.wait (%p3232_p11), [#allocation6], 512   ;;  %p3233_p8 = pmov %p3232_p11 }
  0x85   : > { %2585 = vsyncadd (%p3233_p8), [#allocation6], 4294966784  ;;  %p3234_p13 = pmov %p3233_p8 }
  0x86   : > { %p3235_p6 = pmov %p3233_p8 }
  0x87   : > { %2587 = dma.done.wait (%p3234_p13), [#allocation9], 256  }
  0x88   : > { %2589 = vsyncadd (%p3235_p6), [#allocation9], 4294967040  ;;  %v2618_v0 = vmov 0.0   ;;  %vm2619_vm0 = vmmov 0   ;;  %v2382_v1 = vld [vmem:[#allocation7] sm:$0xff]   ;;  %v2383_v2 = vld [vmem:[#allocation7 + $0x8] sm:$0xff]  }
  0x89   : > { %2134 = vmatprep.subr.bf16.mxu1 %v2618_v0  ;;  %2126 = vmatprep.subr.bf16.mxu0 %v2618_v0  ;;  %v2384_v3 = vld [vmem:[#allocation5] sm:$0xff]   ;;  %v399_v5 = vld [vmem:[%s348_s28 + $0x8] sm:$0xff]  ;;  %vm424_vm1 = vcmask 261120   ;;  %vm600_vm2 = vcmask 64512   ;;  %s2620_s19 = smov 120   ;;  %s2621_s25 = smov 112  }
  0x8a   : > { %2138 = vmatprep.mubr.msk.bf16.mxu1 %vm2619_vm0, %v2618_v0  ;;  %2130 = vmatprep.mubr.msk.bf16.mxu0 %vm2619_vm0, %v2618_v0  ;;  %v398_v4 = vld [vmem:[%s348_s28] sm:$0xff]  ;;  %v2385_v6 = vld [vmem:[#allocation5 + $0x8] sm:$0xff]   ;;  %vm663_vm3 = vcmask 1043456   ;;  %s2622_s28 = smov 104   ;;  %s3088_s18 = scalar_lea.vmem [#allocation10], %s2019_s24 }
  0x8b   : > { %2135 = vmatpush3.bf16.msra.mxu1 %v2382_v1  ;;  %2127 = vmatpush3.bf16.msra.mxu0 %v2384_v3  ;;  %v400_v7 = vpack.c.bf16 %v399_v5, %v398_v4  ;;  %v2028_v8 = vld [vmem:[%s3207_s4] ss:$0 sm:$0xff]  ;;  %v2387_v26 = vld [vmem:[%s3208_s5 + $0x8] sm:$0xff]   ;;  %s2068_s24 = sshll.u32 %s2697_s13, 8  ;;  %s1907_s23 = sshll.u32 %s3088_s18, 4  ;;  %s3156_s23 = int_to_ptr.vmem [resolvable:$true] %s1907_s23 }
  0x8c   : > { %2136 = vmatprep.subr.bf16.mxu1 %v2618_v0  ;;  %2128 = vmatprep.subr.bf16.mxu0 %v2618_v0  ;;  %v2024_v10 = vld [vmem:[%s3205_s2] ss:$0 sm:$0xff]  ;;  %s3236_s26 = sld [smem:[#allocation17_spill]]  ;;  %s1894_s13 = scalar_lea.sflag [#allocation4], %s2878_s29 }
  0x8d   : > { %v2386_v25 = vld [vmem:[%s3208_s5] sm:$0xff]   ;;  %s2534_s20 = scalar_lea.vmem %s3156_s23, 256  ;;  %s2623_s9 = smov [#allocation10]  }
  0x8e   : > { %v2032_v49 = vld [vmem:[%s3209_s6] ss:$0 sm:$0xff]  ;;  %p2535_p10 = scmp.ne.s32.totalorder %s3156_s23, %s2534_s20  ;;  %s2538_s30 = sshll.u32 %s2623_s9, 4  ;;  %s2539_s30 = int_to_ptr.vmem [resolvable:$false] %s2538_s30 }
  0x8f   : > { %2137 = vmatpush3.bf16.msra.mxu1 %v2383_v2  ;;  %2129 = vmatpush3.bf16.msra.mxu0 %v2385_v6  ;;  %v824_v2 = vld [vmem:[#allocation8 + $0x4] sm:$0xf]  ;;  %p2541_p12 = scmp.lt.s32.totalorder %s3156_s23, %s2539_s30 }
  0x90   : > { %2150 = vmatprep.subr.bf16.mxu1 %v2618_v0  ;;  %2142 = vmatprep.subr.bf16.mxu0 %v2618_v0  ;;  %v829_v3 = vsel %vm663_vm3, %v824_v2, 0  ;;  %p2536_p3 = pnand %p2535_p10, %p2830_p5 }
  0x92   : > { %2139 = vmatmul.mubr.msk.bf16.vlgmr.msra.gmra.mrb[0].mxu1 %vm424_vm1, %v400_v7  ;;  %2131 = vmatmul.mubr.msk.bf16.vlgmr.msra.gmra.mrb[0].mxu0 %vm424_vm1, %v400_v7  ;;  %s3154_s21 = scalar_lea.hbm %s3236_s26, %s2068_s24  ;;  %p2537_p7 = pneg %p2536_p3 }
  0x93   : > { %2152 = vmatprep.mubr.msk.bf16.mxu1 %vm2619_vm0, %v2618_v0  ;;  %2146 = vmatprep.mubr.msk.bf16.mxu0 %vm2619_vm0, %v2618_v0 }
  0x94   : > { %2143 = vmatpush3.bf16.msra.mxu0 %v2386_v25 }
  0x95   : > { %2144 = vmatprep.subr.bf16.mxu0 %v2618_v0 }
  0x98   : > { %2145 = vmatpush3.bf16.msra.mxu0 %v2387_v26 }
  0x99   : > { %2156 = vmatprep.subr.bf16.mxu0 %v2618_v0 }
  0x9b   : > { %2147 = vmatmul.mubr.msk.bf16.vlgmr.msra.gmra.mrb[4].mxu0 %vm424_vm1, %v400_v7 }
  0x9c   : > { %2158 = vmatprep.mubr.msk.bf16.mxu0 %vm2619_vm0, %v2618_v0 }
 0x165   : > { %v526_v9 = vpop.f32.mrb[0].mxu1  ;;  %v462_v14 = vpop.f32.mrb[0].mxu0 }
 0x166   : > { %v527_v11 = vadd.f32 %v2028_v8, %v526_v9  ;;  %v2140_v12 = vpop.f32.mrb[1].mxu1  ;;  %v463_v18 = vadd.f32 %v2024_v10, %v462_v14  ;;  %v2132_v19 = vpop.f32.mrb[1].mxu0 }
 0x167   : > { %v529_v13 = vpop.f32.mrb[2].mxu1  ;;  %v465_v20 = vpop.f32.mrb[2].mxu0 }
 0x168   : > { %v2918_v15 = vpack.c.bf16 %v527_v11, %v527_v11  ;;  %v2920_v16 = vadd.f32 %v2028_v8, %v529_v13  ;;  %v2141_v17 = vpop.f32.mrb[3].mxu1  ;;  %v2924_v21 = vpack.c.bf16 %v463_v18, %v463_v18  ;;  %v2928_v23 = vadd.f32 %v2024_v10, %v465_v20  ;;  %v2133_v24 = vpop.f32.mrb[3].mxu0  ;;  %v708_v8 = vld [vmem:[#allocation8] sm:$0xf] }
 0x169   : > { %v875_v11 = vsel %vm663_vm3, %v708_v8, 0 }
 0x16a   : > { %713 = vrot.lane.b32.xlu0 %v2918_v15, %s2620_s19  ;;  %v605_v22 = vsel %vm600_vm2, %v2918_v15, 0 }
 0x16b   : > { %2151 = vmatpush3.bf16.xpose.msra.mxu1 %v605_v22 }
 0x16c   : > { %2162 = vmatprep.subr.bf16.mxu1 %v2618_v0 }
 0x16e   : > { %710 = vrot.lane.b32.xlu0 %v2924_v21, %s2620_s19  ;;  %v590_v45 = vpop.f32.mrb[4].mxu0 }
 0x16f   : > { %v2148_v46 = vpop.f32.mrb[5].mxu0  ;;  %v591_v50 = vadd.f32 %v2032_v49, %v590_v45 }
 0x170   : > { %v593_v51 = vpop.f32.mrb[6].mxu0 }
 0x171   : > { %v2959_v52 = vpack.c.bf16 %v591_v50, %v591_v50  ;;  %v2149_v53 = vpop.f32.mrb[7].mxu0  ;;  %v2961_v54 = vadd.f32 %v2032_v49, %v593_v51 }
 0x172   : > { %2153 = vmatmul.mubr.msk.bf16.vlgmr.msra.gmra.mrb[4].mxu1 %vm600_vm2, %v2924_v21 }
 0x173   : > { %2164 = vmatprep.mubr.msk.bf16.mxu1 %vm2619_vm0, %v2618_v0  ;;  %v665_v55 = vsel %vm663_vm3, %v2959_v52, 0 }
 0x174   : > { %2157 = vmatpush3.bf16.msra.mxu0 %v665_v55 }
 0x175   : > { %2168 = vmatprep.subr.bf16.mxu0 %v2618_v0 }
 0x1dc   : > { %v714_v27 = vpop.permute.xlu0 %713 }
 0x1dd   : > { %v719_v28 = vsel %vm600_vm2, %v714_v27, 0 }
 0x1de   : > { %2163 = vmatpush3.bf16.xpose.msra.mxu1 %v719_v28 }
 0x1df   : > { %2174 = vmatprep.subr.bf16.mxu1 %v2618_v0 }
 0x1e0   : > { %v711_v29 = vpop.permute.xlu0 %710 }
 0x1e5   : > { %2165 = vmatmul.mubr.msk.bf16.vlgmr.msra.gmra.mrb[8].mxu1 %vm600_vm2, %v711_v29 }
 0x1e6   : > { %2176 = vmatprep.mubr.msk.bf16.mxu1 %vm2619_vm0, %v2618_v0  ;;  %2175 = vmatpush3.bf16.msra.mxu1 %v829_v3 }
 0x1e7   : > { %2186 = vmatprep.subr.bf16.mxu1 %v2618_v0 }
 0x245   : > { %v641_v30 = vpop.f32.mrb[4].mxu1 }
 0x246   : > { %v647_v31 = vmul.f32 0.35355338, %v641_v30  ;;  %v2154_v32 = vpop.f32.mrb[5].mxu1 }
 0x247   : > { %v644_v33 = vpop.f32.mrb[6].mxu1 }
 0x248   : > { %v2155_v34 = vpop.f32.mrb[7].mxu1  ;;  %v648_v35 = vsel %vm600_vm2, %v647_v31, -inf }
 0x249   : > { %649 = vmax.xlane.f32.xlu1 %v648_v35 }
 0x2b8   : > { %v755_v36 = vpop.f32.mrb[8].mxu1 }
 0x2b9   : > { %v761_v37 = vmul.f32 0.35355338, %v755_v36  ;;  %v2166_v38 = vpop.f32.mrb[9].mxu1 }
 0x2ba   : > { %v758_v39 = vpop.f32.mrb[10].mxu1 }
 0x2bb   : > { %v2167_v40 = vpop.f32.mrb[11].mxu1  ;;  %v762_v41 = vsel %vm600_vm2, %v761_v37, -inf }
 0x2bc   : > { %763 = vmax.xlane.f32.xlu1 %v762_v41 }
 0x2d6   : > { %v650_v42 = vpop.xlane.xlu1 %649 }
 0x2d7   : > { %v651_v43 = vsub.f32 %v647_v31, %v650_v42 }
 0x2d9   : > { %v652_v44 = vmul.f32 1.442695, %v651_v43 }
 0x2db   : > { %2388 = vpow2.f32 %v652_v44 }
 0x2e5   : > { %v2389_v47 = vpop.eup %2388 }
 0x2e6   : > { %v654_v48 = vsel %vm600_vm2, %v2389_v47, 0.0 }
 0x2e7   : > { %655 = vadd.xlane.f32.xlu0 %v654_v48 }
 0x2fd   : > { %980 = vrot.lane.b32.xlu0 %v2959_v52, %s2621_s25 }
 0x349   : > { %v764_v56 = vpop.xlane.xlu1 %763 }
 0x34a   : > { %v765_v57 = vsub.f32 %v761_v37, %v764_v56 }
 0x34c   : > { %v766_v58 = vmul.f32 1.442695, %v765_v57 }
 0x34e   : > { %2390 = vpow2.f32 %v766_v58 }
 0x358   : > { %v2391_v59 = vpop.eup %2390 }
 0x359   : > { %v768_v60 = vsel %vm600_vm2, %v2391_v59, 0.0 }
 0x35a   : > { %769 = vadd.xlane.f32.xlu1 %v768_v60 }
 0x36b   : > { %775 = vrot.lane.b32.xlu1 %v2959_v52, %s2620_s19 }
 0x36f   : > { %919 = vrot.lane.b32.xlu1 %v2918_v15, %s2621_s25 }
 0x373   : > { %917 = vrot.lane.b32.xlu1 %v2924_v21, %s2621_s25 }
 0x374   : > { %v656_v61 = vpop.xlane.xlu0 %655 }
 0x375   : > { %2392 = vrcp.f32 %v656_v61 }
 0x378   : > { %v981_v12 = vpop.permute.xlu0 %980 }
 0x379   : > { %v986_v19 = vsel %vm663_vm3, %v981_v12, 0 }
 0x37f   : > { %v2393_v62 = vpop.eup %2392 }
 0x380   : > { %v658_v63 = vmul.f32 %v2393_v62, %v2389_v47 }
 0x382   : > { %v659_v1 = vpack.c.bf16 %v658_v63, %v658_v63 }
 0x384   : > { %2159 = vmatmul.mubr.msk.bf16.vlgmr.msra.gmra.mrb[8].mxu0 %vm600_vm2, %v659_v1 }
 0x385   : > { %2170 = vmatprep.mubr.msk.bf16.mxu0 %vm2619_vm0, %v2618_v0 }
 0x3e7   : > { %v770_v4 = vpop.xlane.xlu1 %769 }
 0x3e8   : > { %2394 = vrcp.f32 %v770_v4 }
 0x3eb   : > { %v776_v5 = vpop.permute.xlu1 %775 }
 0x3ec   : > { %v781_v6 = vsel %vm663_vm3, %v776_v5, 0 }
 0x3ed   : > { %2169 = vmatpush3.bf16.msra.mxu0 %v781_v6 }
 0x3ee   : > { %2180 = vmatprep.subr.bf16.mxu0 %v2618_v0 }
 0x3ef   : > { %v920_v22 = vpop.permute.xlu1 %919 }
 0x3f0   : > { %v925_v28 = vsel %vm600_vm2, %v920_v22, 0 }
 0x3f2   : > { %v2395_v7 = vpop.eup %2394 }
 0x3f3   : > { %v772_v9 = vmul.f32 %v2395_v7, %v2391_v59  ;;  %v918_v30 = vpop.permute.xlu1 %917 }
 0x3f5   : > { %v773_v10 = vpack.c.bf16 %v772_v9, %v772_v9 }
 0x3f7   : > { %2171 = vmatmul.mubr.msk.bf16.vlgmr.msra.gmra.mrb[12].mxu0 %vm600_vm2, %v773_v10 }
 0x3f8   : > { %2181 = vmatpush3.bf16.msra.mxu0 %v875_v11  ;;  %2182 = vmatprep.mubr.msk.bf16.mxu0 %vm2619_vm0, %v2618_v0 }
 0x3f9   : > { %2192 = vmatprep.subr.bf16.mxu0 %v2618_v0 }
 0x457   : > { %v701_v13 = vpop.f32.mrb[8].mxu0 }
 0x458   : > { %v707_v14 = vpack.c.bf16 %v701_v13, %v701_v13  ;;  %v2160_v17 = vpop.f32.mrb[9].mxu0  ;;  %v3027_v13 = vpack.c.bf16 %v2920_v16, %v2920_v16 }
 0x459   : > { %v704_v18 = vpop.f32.mrb[10].mxu0 }
 0x45a   : > { %v2161_v20 = vpop.f32.mrb[11].mxu0  ;;  %2183 = vmatmul.mubr.msk.bf16.vlgmr.msra.gmra.mrb[16].mxu0 %vm600_vm2, %v707_v14  ;;  %v3033_v14 = vpack.c.bf16 %v2928_v23, %v2928_v23 }
 0x45b   : > { %2193 = vmatpush3.bf16.msra.mxu0 %v986_v19  ;;  %2194 = vmatprep.mubr.msk.bf16.mxu0 %vm2619_vm0, %v2618_v0 }
 0x45c   : > { %2204 = vmatprep.subr.bf16.mxu0 %v2618_v0 }
 0x4ca   : > { %v817_v24 = vpop.f32.mrb[12].mxu0 }
 0x4cb   : > { %v823_v25 = vpack.c.bf16 %v817_v24, %v817_v24  ;;  %v2172_v26 = vpop.f32.mrb[13].mxu0 }
 0x4cc   : > { %v820_v27 = vpop.f32.mrb[14].mxu0 }
 0x4cd   : > { %v2173_v29 = vpop.f32.mrb[15].mxu0  ;;  %2177 = vmatmul.mubr.msk.bf16.vlgmr.msra.gmra.mrb[12].mxu1 %vm600_vm2, %v823_v25 }
 0x4ce   : > { %2187 = vmatpush3.bf16.xpose.msra.mxu1 %v925_v28  ;;  %2188 = vmatprep.mubr.msk.bf16.mxu1 %vm2619_vm0, %v2618_v0  ;;  %v1253_v29 = vsel %vm600_vm2, %v3027_v13, 0 }
 0x4cf   : > { %2198 = vmatprep.subr.bf16.mxu1 %v2618_v0 }
 0x4d5   : > { %2189 = vmatmul.mubr.msk.bf16.vlgmr.msra.gmra.mrb[16].mxu1 %vm600_vm2, %v918_v30 }
 0x4d6   : > { %2200 = vmatprep.mubr.msk.bf16.mxu1 %vm2619_vm0, %v2618_v0 }
 0x52d   : > { %v911_v31 = vpop.f32.mrb[16].mxu0 }
 0x52e   : > { %v2184_v32 = vpop.f32.mrb[17].mxu0 }
 0x52f   : > { %v914_v33 = vpop.f32.mrb[18].mxu0 }
 0x530   : > { %v2185_v34 = vpop.f32.mrb[19].mxu0  ;;  %v3061_v33 = vpack.c.bf16 %v2961_v54, %v2961_v54 }
 0x5a0   : > { %v865_v35 = vpop.f32.mrb[12].mxu1 }
 0x5a1   : > { %v3000_v36 = vadd.f32 %v911_v31, %v865_v35  ;;  %v2178_v37 = vpop.f32.mrb[13].mxu1 }
 0x5a2   : > { %v868_v38 = vpop.f32.mrb[14].mxu1 }
 0x5a3   : > { %v2179_v39 = vpop.f32.mrb[15].mxu1 }
 0x5a4   : > { %v1312_v39 = vsel %vm663_vm3, %v3061_v33, 0 }
 0x5a8   : > { %v961_v40 = vpop.f32.mrb[16].mxu1 }
 0x5a9   : > { %v967_v41 = vmul.f32 0.35355338, %v961_v40  ;;  %v2190_v42 = vpop.f32.mrb[17].mxu1 }
 0x5aa   : > { %v964_v43 = vpop.f32.mrb[18].mxu1 }
 0x5ab   : > { %v2191_v44 = vpop.f32.mrb[19].mxu1  ;;  %v968_v45 = vsel %vm600_vm2, %v967_v41, -inf }
 0x5ac   : > { %969 = vmax.xlane.f32.xlu1 %v968_v45 }
 0x639   : > { %v970_v46 = vpop.xlane.xlu1 %969 }
 0x63a   : > { %v971_v47 = vsub.f32 %v967_v41, %v970_v46 }
 0x63c   : > { %v972_v48 = vmul.f32 1.442695, %v971_v47 }
 0x63e   : > { %2396 = vpow2.f32 %v972_v48 }
 0x648   : > { %v2397_v49 = vpop.eup %2396 }
 0x649   : > { %v974_v50 = vsel %vm600_vm2, %v2397_v49, 0.0 }
 0x64a   : > { %975 = vadd.xlane.f32.xlu0 %v974_v50 }
 0x660   : > { %1079 = vrot.lane.b32.xlu0 %v2918_v15, %s2622_s28 }
 0x664   : > { %1077 = vrot.lane.b32.xlu0 %v2924_v21, %s2622_s28  ;;  %v1029_v21 = vld [vmem:[#allocation8 + $0x8] sm:$0xf] }
 0x665   : > { %v1034_v59 = vsel %vm663_vm3, %v1029_v21, 0 }
 0x666   : > { %2199 = vmatpush3.bf16.msra.mxu1 %v1034_v59 }
 0x667   : > { %2210 = vmatprep.subr.bf16.mxu1 %v2618_v0 }
 0x6d7   : > { %v976_v51 = vpop.xlane.xlu0 %975 }
 0x6d8   : > { %2398 = vrcp.f32 %v976_v51 }
 0x6db   : > { %v1080_v56 = vpop.permute.xlu0 %1079 }
 0x6dc   : > { %v1085_v58 = vsel %vm600_vm2, %v1080_v56, 0 }
 0x6df   : > { %v1078_v15 = vpop.permute.xlu0 %1077 }
 0x6e2   : > { %v2399_v53 = vpop.eup %2398 }
 0x6e3   : > { %v978_v55 = vmul.f32 %v2399_v53, %v2397_v49 }
 0x6e5   : > { %v979_v57 = vpack.c.bf16 %v978_v55, %v978_v55 }
 0x6e7   : > { %2195 = vmatmul.mubr.msk.bf16.vlgmr.msra.gmra.mrb[20].mxu0 %vm600_vm2, %v979_v57 }
 0x6e8   : > { %2205 = vmatpush3.bf16.xpose.msra.mxu0 %v1085_v58  ;;  %2206 = vmatprep.mubr.msk.bf16.mxu0 %vm2619_vm0, %v2618_v0 }
 0x6e9   : > { %2216 = vmatprep.subr.bf16.mxu0 %v2618_v0 }
 0x6ef   : > { %2207 = vmatmul.mubr.msk.bf16.vlgmr.msra.gmra.mrb[24].mxu0 %vm600_vm2, %v1078_v15 }
 0x6f0   : > { %2218 = vmatprep.mubr.msk.bf16.mxu0 %vm2619_vm0, %v2618_v0 }
 0x7ba   : > { %v1022_v60 = vpop.f32.mrb[20].mxu0 }
 0x7bb   : > { %v1028_v61 = vpack.c.bf16 %v1022_v60, %v1022_v60  ;;  %v2196_v62 = vpop.f32.mrb[21].mxu0 }
 0x7bc   : > { %v1025_v63 = vpop.f32.mrb[22].mxu0  ;;  %v3082_v62 = vld [vmem:[%s3211_s8] ss:$0 sm:$0xff] }
 0x7bd   : > { %v2197_v1 = vpop.f32.mrb[23].mxu0  ;;  %2201 = vmatmul.mubr.msk.bf16.vlgmr.msra.gmra.mrb[20].mxu1 %vm600_vm2, %v1028_v61 }
 0x7be   : > { %2212 = vmatprep.mubr.msk.bf16.mxu1 %vm2619_vm0, %v2618_v0 }
 0x7c2   : > { %v1121_v2 = vpop.f32.mrb[24].mxu0 }
 0x7c3   : > { %v1127_v3 = vmul.f32 0.35355338, %v1121_v2  ;;  %v2208_v4 = vpop.f32.mrb[25].mxu0 }
 0x7c4   : > { %v1124_v5 = vpop.f32.mrb[26].mxu0 }
 0x7c5   : > { %v2209_v6 = vpop.f32.mrb[27].mxu0  ;;  %v1128_v7 = vsel %vm600_vm2, %v1127_v3, -inf }
 0x7c6   : > { %1129 = vmax.xlane.f32.xlu0 %v1128_v7 }
 0x853   : > { %v1130_v8 = vpop.xlane.xlu0 %1129 }
 0x854   : > { %v1131_v9 = vsub.f32 %v1127_v3, %v1130_v8 }
 0x856   : > { %v1132_v10 = vmul.f32 1.442695, %v1131_v9 }
 0x858   : > { %2400 = vpow2.f32 %v1132_v10 }
 0x862   : > { %v2401_v11 = vpop.eup %2400 }
 0x863   : > { %v1134_v12 = vsel %vm600_vm2, %v2401_v11, 0.0 }
 0x864   : > { %1135 = vadd.xlane.f32.xlu1 %v1134_v12 }
 0x875   : > { %1140 = vrot.lane.b32.xlu1 %v2959_v52, %s2622_s28  ;;  %v1189_v52 = vld [vmem:[#allocation8 + $0xc] sm:$0xf] }
 0x876   : > { %v1194_v16 = vsel %vm663_vm3, %v1189_v52, 0 }
 0x877   : > { %2217 = vmatpush3.bf16.msra.mxu0 %v1194_v16 }
 0x878   : > { %2228 = vmatprep.subr.bf16.mxu0 %v2618_v0 }
 0x879   : > { %1360 = vrot.lane.b32.xlu1 %v3027_v13, %s2620_s19 }
 0x87d   : > { %1357 = vrot.lane.b32.xlu1 %v3033_v14, %s2620_s19 }
 0x890   : > { %v1070_v17 = vpop.f32.mrb[20].mxu1 }
 0x891   : > { %v3038_v18 = vadd.f32 %v1070_v17, %v3000_v36  ;;  %v2202_v19 = vpop.f32.mrb[21].mxu1 }
 0x892   : > { %v1073_v20 = vpop.f32.mrb[22].mxu1  ;;  %v1355_v19 = vld [vmem:[#allocation8] sm:$0xf] }
 0x893   : > { %v2203_v22 = vpop.f32.mrb[23].mxu1  ;;  %v1522_v52 = vsel %vm663_vm3, %v1355_v19, 0  ;;  %v1471_v20 = vld [vmem:[#allocation8 + $0x4] sm:$0xf] }
 0x894   : > { %v1476_v16 = vsel %vm663_vm3, %v1471_v20, 0 }
 0x8f1   : > { %v1136_v24 = vpop.xlane.xlu1 %1135 }
 0x8f2   : > { %2402 = vrcp.f32 %v1136_v24 }
 0x8f5   : > { %v1141_v23 = vpop.permute.xlu1 %1140 }
 0x8f6   : > { %v1146_v25 = vsel %vm663_vm3, %v1141_v23, 0 }
 0x8f7   : > { %2211 = vmatpush3.bf16.msra.mxu1 %v1146_v25 }
 0x8f8   : > { %2222 = vmatprep.subr.bf16.mxu1 %v2618_v0 }
 0x8f9   : > { %v1361_v30 = vpop.permute.xlu1 %1360 }
 0x8fa   : > { %v1366_v31 = vsel %vm600_vm2, %v1361_v30, 0 }
 0x8fc   : > { %v2403_v26 = vpop.eup %2402 }
 0x8fd   : > { %v1138_v27 = vmul.f32 %v2403_v26, %v2401_v11  ;;  %v1358_v32 = vpop.permute.xlu1 %1357 }
 0x8ff   : > { %v1139_v28 = vpack.c.bf16 %v1138_v27, %v1138_v27 }
 0x901   : > { %2213 = vmatmul.mubr.msk.bf16.vlgmr.msra.gmra.mrb[24].mxu1 %vm600_vm2, %v1139_v28 }
 0x902   : > { %2223 = vmatpush3.bf16.xpose.msra.mxu1 %v1253_v29  ;;  %2224 = vmatprep.mubr.msk.bf16.mxu1 %vm2619_vm0, %v2618_v0 }
 0x903   : > { %2234 = vmatprep.subr.bf16.mxu1 %v2618_v0 }
 0x909   : > { %2225 = vmatmul.mubr.msk.bf16.vlgmr.msra.gmra.mrb[28].mxu1 %vm600_vm2, %v3033_v14 }
 0x90a   : > { %2235 = vmatpush3.bf16.xpose.msra.mxu1 %v1366_v31  ;;  %2236 = vmatprep.mubr.msk.bf16.mxu1 %vm2619_vm0, %v2618_v0 }
 0x90b   : > { %2246 = vmatprep.subr.bf16.mxu1 %v2618_v0 }
 0x911   : > { %2237 = vmatmul.mubr.msk.bf16.vlgmr.msra.gmra.mrb[32].mxu1 %vm600_vm2, %v1358_v32 }
 0x912   : > { %2248 = vmatprep.mubr.msk.bf16.mxu1 %vm2619_vm0, %v2618_v0  ;;  %2247 = vmatpush3.bf16.msra.mxu1 %v1476_v16 }
 0x913   : > { %2258 = vmatprep.subr.bf16.mxu1 %v2618_v0 }
 0x9d4   : > { %v1182_v34 = vpop.f32.mrb[24].mxu1 }
 0x9d5   : > { %v1188_v35 = vpack.c.bf16 %v1182_v34, %v1182_v34  ;;  %v2214_v36 = vpop.f32.mrb[25].mxu1 }
 0x9d6   : > { %v1185_v37 = vpop.f32.mrb[26].mxu1 }
 0x9d7   : > { %v2215_v38 = vpop.f32.mrb[27].mxu1  ;;  %2219 = vmatmul.mubr.msk.bf16.vlgmr.msra.gmra.mrb[28].mxu0 %vm600_vm2, %v1188_v35 }
 0x9d8   : > { %2229 = vmatpush3.bf16.msra.mxu0 %v1312_v39  ;;  %2230 = vmatprep.mubr.msk.bf16.mxu0 %vm2619_vm0, %v2618_v0 }
 0x9d9   : > { %2240 = vmatprep.subr.bf16.mxu0 %v2618_v0 }
 0x9dc   : > { %v1289_v40 = vpop.f32.mrb[28].mxu1 }
 0x9dd   : > { %v1295_v41 = vmul.f32 0.35355338, %v1289_v40  ;;  %v2226_v54 = vpop.f32.mrb[29].mxu1 }
 0x9de   : > { %v1292_v42 = vpop.f32.mrb[30].mxu1 }
 0x9df   : > { %v2227_v43 = vpop.f32.mrb[31].mxu1  ;;  %v1296_v44 = vsel %vm600_vm2, %v1295_v41, -inf }
 0x9e0   : > { %1297 = vmax.xlane.f32.xlu1 %v1296_v44 }
 0x9e4   : > { %v1402_v45 = vpop.f32.mrb[32].mxu1 }
 0x9e5   : > { %v1408_v46 = vmul.f32 0.35355338, %v1402_v45  ;;  %v2238_v47 = vpop.f32.mrb[33].mxu1 }
 0x9e6   : > { %v1405_v48 = vpop.f32.mrb[34].mxu1 }
 0x9e7   : > { %v2239_v49 = vpop.f32.mrb[35].mxu1  ;;  %v1409_v50 = vsel %vm600_vm2, %v1408_v46, -inf }
 0x9e8   : > { %1410 = vmax.xlane.f32.xlu0 %v1409_v50 }
 0x9f1   : > { %1564 = vrot.lane.b32.xlu1 %v3033_v14, %s2621_s25 }
 0xa6d   : > { %v1298_v51 = vpop.xlane.xlu1 %1297 }
 0xa6e   : > { %v1299_v53 = vsub.f32 %v1295_v41, %v1298_v51 }
 0xa70   : > { %v1300_v55 = vmul.f32 1.442695, %v1299_v53 }
 0xa71   : > { %v1565_v35 = vpop.permute.xlu1 %1564 }
 0xa72   : > { %2404 = vpow2.f32 %v1300_v55 }
 0xa75   : > { %v1411_v56 = vpop.xlane.xlu0 %1410 }
 0xa76   : > { %v1412_v57 = vsub.f32 %v1408_v46, %v1411_v56 }
 0xa78   : > { %v1413_v58 = vmul.f32 1.442695, %v1412_v57 }
 0xa7a   : > { %2406 = vpow2.f32 %v1413_v58 }
 0xa7c   : > { %v2405_v15 = vpop.eup %2404 }
 0xa7d   : > { %v1302_v21 = vsel %vm600_vm2, %v2405_v15, 0.0 }
 0xa7e   : > { %1303 = vadd.xlane.f32.xlu0 %v1302_v21 }
 0xa84   : > { %v2407_v59 = vpop.eup %2406 }
 0xa85   : > { %v1415_v60 = vsel %vm600_vm2, %v2407_v59, 0.0 }
 0xa86   : > { %1416 = vadd.xlane.f32.xlu0 %v1415_v60 }
 0xa9c   : > { %1422 = vrot.lane.b32.xlu0 %v3061_v33, %s2620_s19 }
 0xaa0   : > { %1566 = vrot.lane.b32.xlu0 %v3027_v13, %s2621_s25 }
 0xaaa   : > { %v1230_v61 = vpop.f32.mrb[28].mxu0 }
 0xaab   : > { %v1236_v63 = vadd.f32 %v1230_v61, %v3038_v18  ;;  %v2220_v1 = vpop.f32.mrb[29].mxu0 }
 0xaac   : > { %v1233_v2 = vpop.f32.mrb[30].mxu0 }
 0xaad   : > { %v1244_v3 = vadd.f32 %v3082_v62, %v1236_v63  ;;  %v2221_v4 = vpop.f32.mrb[31].mxu0 }
 0xaaf   : > { %1245 = vst.msk [vmem:[%s3088_s18] sm:$0xff] %vm424_vm1, %v1244_v3 }
 0xb0b   : > { %v1304_v5 = vpop.xlane.xlu0 %1303 }
 0xb0c   : > { %2408 = vrcp.f32 %v1304_v5 }
 0xb13   : > { %v1417_v6 = vpop.xlane.xlu0 %1416 }
 0xb14   : > { %2410 = vrcp.f32 %v1417_v6 }
 0xb16   : > { %v2409_v7 = vpop.eup %2408 }
 0xb17   : > { %v1306_v8 = vmul.f32 %v2409_v7, %v2405_v15  ;;  %v1423_v9 = vpop.permute.xlu0 %1422 }
 0xb18   : > { %v1428_v11 = vsel %vm663_vm3, %v1423_v9, 0 }
 0xb19   : > { %v1307_v10 = vpack.c.bf16 %v1306_v8, %v1306_v8 }
 0xb1b   : > { %2231 = vmatmul.mubr.msk.bf16.vlgmr.msra.gmra.mrb[32].mxu0 %vm600_vm2, %v1307_v10  ;;  %v1567_v27 = vpop.permute.xlu0 %1566 }
 0xb1c   : > { %2241 = vmatpush3.bf16.msra.mxu0 %v1428_v11  ;;  %2242 = vmatprep.mubr.msk.bf16.mxu0 %vm2619_vm0, %v2618_v0  ;;  %v1572_v32 = vsel %vm600_vm2, %v1567_v27, 0 }
 0xb1d   : > { %2252 = vmatprep.subr.bf16.mxu0 %v2618_v0 }
 0xb1e   : > { %v2411_v12 = vpop.eup %2410 }
 0xb1f   : > { %v1419_v17 = vmul.f32 %v2411_v12, %v2407_v59 }
 0xb21   : > { %v1420_v18 = vpack.c.bf16 %v1419_v17, %v1419_v17 }
 0xb23   : > { %2243 = vmatmul.mubr.msk.bf16.vlgmr.msra.gmra.mrb[36].mxu0 %vm600_vm2, %v1420_v18 }
 0xb24   : > { %2254 = vmatprep.mubr.msk.bf16.mxu0 %vm2619_vm0, %v2618_v0  ;;  %2253 = vmatpush3.bf16.msra.mxu0 %v1522_v52 }
 0xb25   : > { %2264 = vmatprep.subr.bf16.mxu0 %v2618_v0 }
 0xbee   : > { %v1348_v22 = vpop.f32.mrb[32].mxu0 }
 0xbef   : > { %v1354_v24 = vpack.c.bf16 %v1348_v22, %v1348_v22  ;;  %v2232_v23 = vpop.f32.mrb[33].mxu0  ;;  %v1836_v22 = vld [vmem:[#allocation8 + $0xc] sm:$0xf] }
 0xbf0   : > { %v1351_v25 = vpop.f32.mrb[34].mxu0 }
 0xbf1   : > { %v2233_v26 = vpop.f32.mrb[35].mxu0  ;;  %2255 = vmatmul.mubr.msk.bf16.vlgmr.msra.gmra.mrb[40].mxu0 %vm600_vm2, %v1354_v24  ;;  %v1841_v24 = vsel %vm663_vm3, %v1836_v22, 0 }
 0xbf2   : > { %2266 = vmatprep.mubr.msk.bf16.mxu0 %vm2619_vm0, %v2618_v0 }
 0xbf6   : > { %v1464_v28 = vpop.f32.mrb[36].mxu0 }
 0xbf7   : > { %v1470_v29 = vpack.c.bf16 %v1464_v28, %v1464_v28  ;;  %v2244_v30 = vpop.f32.mrb[37].mxu0 }
 0xbf8   : > { %v1467_v31 = vpop.f32.mrb[38].mxu0 }
 0xbf9   : > { %v2245_v34 = vpop.f32.mrb[39].mxu0  ;;  %2249 = vmatmul.mubr.msk.bf16.vlgmr.msra.gmra.mrb[36].mxu1 %vm600_vm2, %v1470_v29 }
 0xbfa   : > { %2259 = vmatpush3.bf16.xpose.msra.mxu1 %v1572_v32  ;;  %2260 = vmatprep.mubr.msk.bf16.mxu1 %vm2619_vm0, %v2618_v0 }
 0xbfb   : > { %2270 = vmatprep.subr.bf16.mxu1 %v2618_v0 }
 0xc01   : > { %2261 = vmatmul.mubr.msk.bf16.vlgmr.msra.gmra.mrb[40].mxu1 %vm600_vm2, %v1565_v35 }
 0xc02   : > { %2272 = vmatprep.mubr.msk.bf16.mxu1 %vm2619_vm0, %v2618_v0 }
 0xcc4   : > { %v1558_v36 = vpop.f32.mrb[40].mxu0 }
 0xcc5   : > { %v2256_v37 = vpop.f32.mrb[41].mxu0 }
 0xcc6   : > { %v1561_v38 = vpop.f32.mrb[42].mxu0 }
 0xcc7   : > { %v2257_v39 = vpop.f32.mrb[43].mxu0 }
 0xccc   : > { %v1512_v40 = vpop.f32.mrb[36].mxu1 }
 0xccd   : > { %v3115_v41 = vadd.f32 %v1558_v36, %v1512_v40  ;;  %v2250_v54 = vpop.f32.mrb[37].mxu1 }
 0xcce   : > { %v1515_v42 = vpop.f32.mrb[38].mxu1 }
 0xccf   : > { %v2251_v43 = vpop.f32.mrb[39].mxu1 }
 0xcd4   : > { %v1608_v44 = vpop.f32.mrb[40].mxu1 }
 0xcd5   : > { %v1614_v45 = vmul.f32 0.35355338, %v1608_v44  ;;  %v2262_v46 = vpop.f32.mrb[41].mxu1 }
 0xcd6   : > { %v1611_v47 = vpop.f32.mrb[42].mxu1 }
 0xcd7   : > { %v2263_v48 = vpop.f32.mrb[43].mxu1  ;;  %v1615_v49 = vsel %vm600_vm2, %v1614_v45, -inf }
 0xcd8   : > { %1616 = vmax.xlane.f32.xlu0 %v1615_v49 }
 0xcee   : > { %1627 = vrot.lane.b32.xlu0 %v3061_v33, %s2621_s25  ;;  %s2540_s25 = scalar_lea.vmem %s2539_s30, 512 }
 0xcef   : > { %p2542_p1 = scmp.lt.s32.totalorder %s2540_s25, %s2534_s20 }
 0xcf1   : > { %p2543_p2 = por %p2542_p1, %p2541_p12 }
 0xcf2   : > { %1724 = vrot.lane.b32.xlu0 %v3033_v14, %s2622_s28 }
 0xcf3   : > { %p2544_p4 = pnand %p2543_p2, %p2537_p7 }
 0xd65   : > { %v1617_v50 = vpop.xlane.xlu0 %1616 }
 0xd66   : > { %v1618_v51 = vsub.f32 %v1614_v45, %v1617_v50 }
 0xd68   : > { %v1619_v53 = vmul.f32 1.442695, %v1618_v51 }
 0xd69   : > { %v1628_v55 = vpop.permute.xlu0 %1627 }
 0xd6a   : > { %2412 = vpow2.f32 %v1619_v53  ;;  %v1633_v56 = vsel %vm663_vm3, %v1628_v55, 0 }
 0xd6b   : > { %2265 = vmatpush3.bf16.msra.mxu0 %v1633_v56 }
 0xd6c   : > { %2276 = vmatprep.subr.bf16.mxu0 %v2618_v0 }
 0xd6d   : > { %v1725_v63 = vpop.permute.xlu0 %1724 }
 0xd74   : > { %v2413_v57 = vpop.eup %2412 }
 0xd75   : > { %v1621_v58 = vsel %vm600_vm2, %v2413_v57, 0.0 }
 0xd76   : > { %1622 = vadd.xlane.f32.xlu1 %v1621_v58 }
 0xd87   : > { %1726 = vrot.lane.b32.xlu1 %v3027_v13, %s2622_s28  ;;  %v1676_v13 = vld [vmem:[#allocation8 + $0x8] sm:$0xf] }
 0xd88   : > { %v1681_v1 = vsel %vm663_vm3, %v1676_v13, 0 }
 0xd89   : > { %2271 = vmatpush3.bf16.msra.mxu1 %v1681_v1 }
 0xd8a   : > { %2282 = vmatprep.subr.bf16.mxu1 %v2618_v0 }
 0xe03   : > { %v1623_v15 = vpop.xlane.xlu1 %1622 }
 0xe04   : > { %2414 = vrcp.f32 %v1623_v15 }
 0xe07   : > { %v1727_v59 = vpop.permute.xlu1 %1726 }
 0xe08   : > { %v1732_v61 = vsel %vm600_vm2, %v1727_v59, 0 }
 0xe0e   : > { %v2415_v14 = vpop.eup %2414 }
 0xe0f   : > { %v1625_v21 = vmul.f32 %v2415_v14, %v2413_v57 }
 0xe11   : > { %v1626_v60 = vpack.c.bf16 %v1625_v21, %v1625_v21 }
 0xe13   : > { %2267 = vmatmul.mubr.msk.bf16.vlgmr.msra.gmra.mrb[44].mxu0 %vm600_vm2, %v1626_v60 }
 0xe14   : > { %2277 = vmatpush3.bf16.xpose.msra.mxu0 %v1732_v61  ;;  %2278 = vmatprep.mubr.msk.bf16.mxu0 %vm2619_vm0, %v2618_v0 }
 0xe15   : > { %2288 = vmatprep.subr.bf16.mxu0 %v2618_v0 }
 0xe1b   : > { %2279 = vmatmul.mubr.msk.bf16.vlgmr.msra.gmra.mrb[48].mxu0 %vm600_vm2, %v1725_v63 }
 0xe1c   : > { %2290 = vmatprep.mubr.msk.bf16.mxu0 %vm2619_vm0, %v2618_v0  ;;  %2289 = vmatpush3.bf16.msra.mxu0 %v1841_v24 }
 0xee6   : > { %v1669_v2 = vpop.f32.mrb[44].mxu0 }
 0xee7   : > { %v1675_v3 = vpack.c.bf16 %v1669_v2, %v1669_v2  ;;  %v2268_v4 = vpop.f32.mrb[45].mxu0 }
 0xee8   : > { %v1672_v5 = vpop.f32.mrb[46].mxu0 }
 0xee9   : > { %v2269_v6 = vpop.f32.mrb[47].mxu0  ;;  %2273 = vmatmul.mubr.msk.bf16.vlgmr.msra.gmra.mrb[44].mxu1 %vm600_vm2, %v1675_v3 }
 0xeea   : > { %2284 = vmatprep.mubr.msk.bf16.mxu1 %vm2619_vm0, %v2618_v0 }
 0xeee   : > { %v1768_v7 = vpop.f32.mrb[48].mxu0 }
 0xeef   : > { %v1774_v8 = vmul.f32 0.35355338, %v1768_v7  ;;  %v2280_v9 = vpop.f32.mrb[49].mxu0 }
 0xef0   : > { %v1771_v10 = vpop.f32.mrb[50].mxu0 }
 0xef1   : > { %v2281_v11 = vpop.f32.mrb[51].mxu0  ;;  %v1775_v12 = vsel %vm600_vm2, %v1774_v8, -inf }
 0xef2   : > { %1776 = vmax.xlane.f32.xlu0 %v1775_v12 }
 0xf08   : > { %1787 = vrot.lane.b32.xlu0 %v3061_v33, %s2622_s28 }
 0xf7f   : > { %v1777_v17 = vpop.xlane.xlu0 %1776 }
 0xf80   : > { %v1778_v18 = vsub.f32 %v1774_v8, %v1777_v17 }
 0xf82   : > { %v1779_v19 = vmul.f32 1.442695, %v1778_v18 }
 0xf83   : > { %v1788_v52 = vpop.permute.xlu0 %1787 }
 0xf84   : > { %2416 = vpow2.f32 %v1779_v19  ;;  %v1793_v20 = vsel %vm663_vm3, %v1788_v52, 0 }
 0xf85   : > { %2283 = vmatpush3.bf16.msra.mxu1 %v1793_v20 }
 0xf8e   : > { %v2417_v0 = vpop.eup %2416 }
 0xf8f   : > { %v1781_v16 = vsel %vm600_vm2, %v2417_v0, 0.0 }
 0xf90   : > { %1782 = vadd.xlane.f32.xlu1 %v1781_v16 }
 0xfbc   : > { %v1717_v23 = vpop.f32.mrb[44].mxu1 }
 0xfbd   : > { %v1723_v25 = vadd.f32 %v1717_v23, %v3115_v41  ;;  %v2274_v33 = vpop.f32.mrb[45].mxu1 }
 0xfbe   : > { %v1720_v26 = vpop.f32.mrb[46].mxu1 }
 0xfbf   : > { %v2275_v27 = vpop.f32.mrb[47].mxu1 }
0x101d   : > { %v1783_v28 = vpop.xlane.xlu1 %1782 }
0x101e   : > { %2418 = vrcp.f32 %v1783_v28 }
0x1028   : > { %v2419_v29 = vpop.eup %2418 }
0x1029   : > { %v1785_v30 = vmul.f32 %v2419_v29, %v2417_v0 }
0x102b   : > { %v1786_v31 = vpack.c.bf16 %v1785_v30, %v1785_v30 }
0x102d   : > { %2285 = vmatmul.mubr.msk.bf16.vlgmr.msra.gmra.mrb[48].mxu1 %vm600_vm2, %v1786_v31 }
0x1100   : > { %v1829_v32 = vpop.f32.mrb[48].mxu1 }
0x1101   : > { %v1835_v34 = vpack.c.bf16 %v1829_v32, %v1829_v32  ;;  %v2286_v35 = vpop.f32.mrb[49].mxu1 }
0x1102   : > { %v1832_v36 = vpop.f32.mrb[50].mxu1 }
0x1103   : > { %v2287_v37 = vpop.f32.mrb[51].mxu1  ;;  %2291 = vmatmul.mubr.msk.bf16.vlgmr.msra.gmra.mrb[52].mxu0 %vm600_vm2, %v1835_v34 }
0x11d6   : > { %v1877_v38 = vpop.f32.mrb[52].mxu0 }
0x11d7   : > { %v1883_v39 = vadd.f32 %v1877_v38, %v1723_v25  ;;  %v2292_v40 = vpop.f32.mrb[53].mxu0 }
0x11d8   : > { %v1880_v41 = vpop.f32.mrb[54].mxu0 }
0x11d9   : > { %v1891_v54 = vadd.f32 %v3082_v62, %v1883_v39  ;;  %v2293_v42 = vpop.f32.mrb[55].mxu0 }
0x11db   : > { %1892 = vst.msk [vmem:[%s3088_s18 + $0x8] sm:$0xff] %vm424_vm1, %v1891_v54 }
0x11dc   : > { %2547 = shalt.err (!%p2544_p4)
}
0x11dd   : > { %s2548_s28 = scalar_lea.hbm %s3154_s21, 256  ;;  %s2552_s18 = scalar_lea.hbm %s3236_s26, 512 }
0x11de   : > { %p2549_p9 = scmp.ne.s32.totalorder %s3154_s21, %s2548_s28  ;;  %p2553_p8 = scmp.lt.u32.totalorder %s3154_s21, %s3236_s26 }
0x11df   : > { %p2554_p13 = scmp.lt.u32.totalorder %s2552_s18, %s2548_s28  ;;  %p2556_p10 = scmp.lt.u32.totalorder %s2548_s28, %s3154_s21 }
0x11e0   : > { %p2550_p0 = pnand %p2549_p9, %p2830_p5 }
0x11e1   : > { %p2555_p6 = por %p2554_p13, %p2553_p8 }
0x11e2   : > { %p2551_p11 = pneg %p2550_p0 }
0x11e3   : > { %p2557_p3 = por %p2556_p10, %p2555_p6 }
0x11e5   : > { %p2558_p7 = pnand %p2557_p3, %p2551_p11 }
0x11e7   : > { %2561 = shalt.err (!%p2558_p7)
}
0x11e8   : > { %s2624_s22 = smov 128   ;;  %s2625_s20 = smov 8  }
0x11e9   : > { %2308 = dma.vmem_to_hbm [thread:$0]  (%p2830_p5), %s3156_s23, 256, %s3154_s21, %s1894_s13, %s2624_s22, %s2624_s22, %s2625_s20  }
0x11ea PF: > { %s3237_s9 = sld [smem:[#allocation15_spill]]  ;;  %s3238_s30 = sld [smem:[#allocation16_spill]] }
0x11eb   : > { %p3240_p1 = scmp.ge.s32.totalorder %s2608_s12, 2 }
0x11f0   : > { %s1922_s25 = sand.u32 1, %s3237_s9   ;;  %p3239_p12 = scmp.ne.s32.totalorder %s3238_s30, 0 }
0x11f1   : > { %s1923_s28 = scalar_lea.sflag [#allocation4], %s1922_s25 }
0x11f2   : > { %p2325_p2 = pnand %p3240_p1, %p3239_p12 }
0x11f4   : > { %2591 = dma.done.wait (!%p2325_p2), %s1923_s28, 256  }
0x11f5   : > { %2593 = vsyncadd (!%p2325_p2), %s1923_s28, 4294967040  ;;  %p24_p4 = scmp.ge.s32.totalorder %s2816_s14, 4   ;;  %s3241_s30 = smov %s2600_s10 }
0x11f6   : > { %s3242_s10 = smov %s2604_s11  ;;  %s3243_s11 = smov %s2826_s16 }
0x11f7   : > { %s3244_s12 = smov %s2816_s14  ;;  %26 = sbr.rel (!%p24_p4) target bundleno = 9 (0x9), region = 113 }
0x11fe   :  { %1928 = vsyncpa [#allocation3], 1 }
0x11ff   :  { %1930 = vsyncpa [#allocation3 + $0x1], 1 }
0x1200   :  { %1931 = vsyncpa [#allocation6], 1 }
0x1201   :  { %1932 = vsyncpa [#allocation9], 1 }
0x1202   :  { %1933 = vsyncpa [#allocation4], 1 }
0x1203   :  { %1935 = vsyncpa [#allocation4 + $0x1], 1 }

</bundles_post_ra>
